<compile_context>
chip_gen: v5e
topology: v5e:2x2
jax: 0.10.0
libtpu: 0.0.40
codegen_flags: <defaults>
</compile_context>

<pallas_src>
import jax
import jax.numpy as jnp
from jax import lax
from jax.experimental import pallas as pl
from jax.experimental.pallas import tpu as pltpu


def _downsample_conv_kernel(xm_ref, xh_ref, w_ref, b_ref, o_ref, acc_ref):
    # xm_ref : (1, 4, TM, Wh, C)   parity planes, main rows [R, R+TM)
    #          xm[0, 2a+b, i, j, c] == x_pad[2*(R+i)+a, 2*j+b, c]
    # xh_ref : (1, 2, 1, Wh, C)    halo row R+TM of the a==0 planes (b=0,1)
    # w_ref  : (9, C, Co)          per-tap weights, tap index = 3*kh + kw
    # b_ref  : (1, Co)             bias (f32)
    # o_ref  : (1, TM, Wp, Co)     output rows [R, R+TM)
    # acc_ref: (TM*Wp, Co) f32 scratch accumulator
    _, TM, Wp, Co = o_ref.shape
    C = w_ref.shape[1]

    def tap_dot(patch2d, tap):
        return jnp.dot(patch2d, w_ref[tap], preferred_element_type=jnp.float32)

    # --- kh in {0, 1}: taps that only need the main TM parity rows ------------
    first = True
    for kh in range(2):
        for kw in range(3):
            p = 2 * (kh % 2) + (kw % 2)          # parity plane
            dc = kw // 2                         # column offset (0 or 1)
            patch = xm_ref[0, p, :, dc:dc + Wp, :]          # (TM, Wp, C)
            contrib = tap_dot(patch.reshape(TM * Wp, C), 3 * kh + kw)
            if first:
                # Fold the bias into the first tap: no separate zero-init pass.
                acc_ref[...] = contrib + b_ref[0].astype(jnp.float32)
                first = False
            else:
                acc_ref[...] += contrib

    # --- kh == 2: taps read parity rows shifted down by one -------------------
    # output rows 0..TM-2 come from main rows 1..TM-1, row TM-1 from the halo.
    for kw in range(3):
        p = kw % 2                               # a == 0 planes only
        dc = kw // 2
        tap = 6 + kw
        if TM > 1:
            body = xm_ref[0, p, 1:, dc:dc + Wp, :]          # (TM-1, Wp, C)
            acc_ref[pl.ds(0, (TM - 1) * Wp)] += tap_dot(
                body.reshape((TM - 1) * Wp, C), tap)
        halo = xh_ref[0, p, 0, dc:dc + Wp, :]               # (Wp, C)
        acc_ref[pl.ds((TM - 1) * Wp, Wp)] += tap_dot(halo, tap)

    # Single lane-dense store of the finished row block.
    o_ref[0] = acc_ref[...].reshape(TM, Wp, Co).astype(o_ref.dtype)


def downsample(x, weight, bias, *, block_rows=8, compute_dtype=jnp.bfloat16):
    """Equivalent of nn.Conv2d(C, C, kernel_size=3, stride=2, padding=1)(x).

    x: (N, C, H, W); weight: (C_out, C_in, 3, 3); bias: (C_out,).
    Returns (N, C_out, H_out, W_out) with H_out = (H - 1)//2 + 1.
    """
    N, C, H, W = x.shape
    C_out, C_in, KH, KW = weight.shape
    assert (KH, KW) == (3, 3) and C_in == C

    H_out = (H - 1) // 2 + 1
    W_out = (W - 1) // 2 + 1

    # Row tiling / alignment choices.
    TM = max(1, min(block_rows, H_out))          # output rows per grid step
    n_rb = pl.cdiv(H_out, TM)                    # row blocks
    H_out_pad = n_rb * TM
    w_mult = 16 if compute_dtype == jnp.bfloat16 else 8   # sublane-tile align
    W_out_pad = ((W_out + w_mult - 1) // w_mult) * w_mult

    # Parity-plane ("space-to-depth") sizes.  +1 row/col so (a) the kw/kh == 2
    # taps have their shifted column/row and (b) every row block (including the
    # last) has a valid 1-row halo.
    Hh = H_out_pad + 1
    Wh = W_out_pad + 1
    Hp_e = 2 * Hh
    Wp_e = 2 * Wh

    # One pad pass (also the conv's padding=1), then one fused
    # transpose/reshape/cast pass: NCHW -> parity-split NHWC in compute dtype.
    x_pad = jnp.pad(x, ((0, 0), (0, 0), (1, Hp_e - H - 1), (1, Wp_e - W - 1)))
    x_par = (x_pad.reshape(N, C, Hh, 2, Wh, 2)
                  .transpose(0, 3, 5, 2, 4, 1)            # (N, 2, 2, Hh, Wh, C)
                  .reshape(N, 4, Hh, Wh, C)
                  .astype(compute_dtype))

    # (C_out, C_in, 3, 3) -> (9, C_in, C_out); taps indexed by 3*kh + kw.
    w_taps = (jnp.transpose(weight, (2, 3, 1, 0))
                 .reshape(9, C_in, C_out)
                 .astype(compute_dtype))
    b2 = bias.reshape(1, C_out).astype(jnp.float32)

    out_nhwc = pl.pallas_call(
        _downsample_conv_kernel,
        out_shape=jax.ShapeDtypeStruct((N, H_out_pad, W_out_pad, C_out),
                                       x.dtype),
        grid_spec=pltpu.PrefetchScalarGridSpec(
            num_scalar_prefetch=0,
            grid=(N, n_rb),
            in_specs=[
                # Main rows [r*TM, (r+1)*TM) of all 4 parity planes.
                pl.BlockSpec((1, 4, TM, Wh, C), lambda n, r: (n, 0, r, 0, 0)),
                # 1-row halo: row (r+1)*TM of the a==0 planes.  Block size 1
                # along Hh, so the returned block index IS the element row.
                pl.BlockSpec((1, 2, 1, Wh, C),
                             lambda n, r: (n, 0, (r + 1) * TM, 0, 0)),
                # Constant index maps -> weights / bias stay VMEM-resident.
                pl.BlockSpec((9, C_in, C_out), lambda n, r: (0, 0, 0)),
                pl.BlockSpec((1, C_out), lambda n, r: (0, 0)),
            ],
            out_specs=pl.BlockSpec((1, TM, W_out_pad, C_out),
                                   lambda n, r: (n, r, 0, 0)),
            scratch_shapes=[pltpu.VMEM((TM * W_out_pad, C_out), jnp.float32)],
        ),
        compiler_params=pltpu.CompilerParams(
            # No reduction grid axis: every step writes a distinct output
            # block, so both axes can be sharded across v7x's two TensorCores.
            dimension_semantics=("parallel", "parallel"),
            # Row-tiled blocks are small; 32 MiB leaves headroom even on
            # v7x's 64 MiB physical VMEM.
            vmem_limit_bytes=32 * 1024 * 1024,
        ),
    )(x_par, x_par, w_taps, b2)

    # One slice + transpose pass back to the PyTorch NCHW layout.
    return jnp.transpose(out_nhwc[:, :H_out, :W_out, :], (0, 3, 1, 2))


def _downsample_ref(x, weight, bias):
    out = lax.conv_general_dilated(
        x.astype(jnp.float32), weight.astype(jnp.float32),
        window_strides=(2, 2), padding=((1, 1), (1, 1)),
        dimension_numbers=("NCHW", "OIHW", "NCHW"),
        precision=lax.Precision.HIGHEST)
    return out + bias.astype(jnp.float32)[None, :, None, None]


if __name__ == "__main__":
    key = jax.random.PRNGKey(0)

    def check(N, C, H, W, block_rows):
        kx, kw, kb = jax.random.split(jax.random.fold_in(key, N * 1000 + H), 3)
        x = jax.random.normal(kx, (N, C, H, W), dtype=jnp.float32)
        weight = 0.05 * jax.random.normal(kw, (C, C, 3, 3), dtype=jnp.float32)
        bias = 0.1 * jax.random.normal(kb, (C,), dtype=jnp.float32)

        out = downsample(x, weight, bias, block_rows=block_rows)
        out = jax.block_until_ready(out)

        # Kernel feeds the MXU in bf16 with f32 accumulation, so compare
        # against the f32 conv of bf16-rounded inputs (only the accumulation
        # order differs -> tight tolerance stays valid).
        xq = x.astype(jnp.bfloat16).astype(jnp.float32)
        wq = weight.astype(jnp.bfloat16).astype(jnp.float32)
        ref = _downsample_ref(xq, wq, bias)

        H_out = (H - 1) // 2 + 1
        W_out = (W - 1) // 2 + 1
        assert out.shape == (N, C, H_out, W_out), out.shape
        assert jnp.allclose(out.astype(jnp.float32), ref,
                            atol=2e-3, rtol=2e-3), \
            f"mismatch vs lax.conv reference at {(N, C, H, W)}"

    # Multiple row blocks (exercises the halo row handoff between blocks).
    check(2, 128, 16, 16, block_rows=4)
    # Odd spatial sizes (exercises zero-padding of rows/cols and W alignment).
    check(1, 64, 15, 13, block_rows=8)

    print("KERNEL_OK")
</pallas_src>

<mosaic_0001>
module attributes {stable_mosaic.version = 11 : i64} {
  func.func @_downsample_conv_kernel(%arg0: i32, %arg1: i32, %arg2: memref<1x4x4x17x128xbf16, #tpu.memory_space<vmem>>, %arg3: memref<1x2x1x17x128xbf16, #tpu.memory_space<vmem>>, %arg4: memref<9x128x128xbf16, #tpu.memory_space<vmem>>, %arg5: memref<1x128xf32, #tpu.memory_space<vmem>>, %arg6: memref<1x4x16x128xf32, #tpu.memory_space<vmem>>, %arg7: memref<64x128xf32, #tpu.memory_space<vmem>>) attributes {dimension_semantics = [#tpu.dimension_semantics<parallel>, #tpu.dimension_semantics<parallel>], iteration_bounds = array<i64: 2, 2>, scalar_prefetch = 0 : i64, scratch_operands = 1 : i64, tpu.core_type = #tpu.core_type<tc>, window_params = [{transform_indices = @transform_0, window_bounds = array<i64: 1, 4, 4, 17, 128>}, {transform_indices = @transform_1, window_bounds = array<i64: 1, 2, 1, 17, 128>}, {pipeline_mode = #tpu.pipeline_mode<synchronous>, transform_indices = @transform_2, window_bounds = array<i64: 9, 128, 128>}, {pipeline_mode = #tpu.pipeline_mode<synchronous>, transform_indices = @transform_3, window_bounds = array<i64: 1, 128>}, {transform_indices = @transform_4, window_bounds = array<i64: 1, 4, 16, 128>}]} {
    %c0 = arith.constant 0 : index
    %c0_0 = arith.constant 0 : index
    %c0_1 = arith.constant 0 : index
    %c0_2 = arith.constant 0 : index
    %c0_3 = arith.constant 0 : index
    %0 = vector.load %arg2[%c0, %c0_0, %c0_1, %c0_2, %c0_3] : memref<1x4x4x17x128xbf16, #tpu.memory_space<vmem>>, vector<1x1x4x16x128xbf16>
    %1 = vector.shape_cast %0 : vector<1x1x4x16x128xbf16> to vector<4x16x128xbf16>
    %2 = vector.shape_cast %1 : vector<4x16x128xbf16> to vector<64x128xbf16>
    %c0_4 = arith.constant 0 : index
    %c0_5 = arith.constant 0 : index
    %c0_6 = arith.constant 0 : index
    %3 = vector.load %arg4[%c0_4, %c0_5, %c0_6] : memref<9x128x128xbf16, #tpu.memory_space<vmem>>, vector<1x128x128xbf16>
    %4 = vector.shape_cast %3 : vector<1x128x128xbf16> to vector<128x128xbf16>
    %cst = arith.constant dense<0.000000e+00> : vector<64x128xf32>
    %5 = tpu.matmul %2, %4, %cst {dimension_numbers = #tpu.dot_dimension_numbers<[1], [0], [0], [1], [0, 0, 1, 1], [], []>} : vector<64x128xbf16>, vector<128x128xbf16>, vector<64x128xf32> -> vector<64x128xf32>
    %c0_7 = arith.constant 0 : index
    %c0_8 = arith.constant 0 : index
    %6 = vector.load %arg5[%c0_7, %c0_8] : memref<1x128xf32, #tpu.memory_space<vmem>>, vector<1x128xf32>
    %7 = vector.shape_cast %6 : vector<1x128xf32> to vector<128xf32>
    %8 = vector.shape_cast %7 : vector<128xf32> to vector<1x128xf32>
    %9 = vector.broadcast %8 : vector<1x128xf32> to vector<64x128xf32>
    %10 = arith.addf %5, %9 : vector<64x128xf32>
    %c0_9 = arith.constant 0 : index
    %c0_10 = arith.constant 0 : index
    %11 = vector.load %arg7[%c0_9, %c0_10] : memref<64x128xf32, #tpu.memory_space<vmem>>, vector<64x128xf32>
    tpu.vector_store %arg7[%c0_9, %c0_10], %10 {strides = array<i32>} : memref<64x128xf32, #tpu.memory_space<vmem>>, vector<64x128xf32>,
    %c0_11 = arith.constant 0 : index
    %c1 = arith.constant 1 : index
    %c0_12 = arith.constant 0 : index
    %c0_13 = arith.constant 0 : index
    %c0_14 = arith.constant 0 : index
    %12 = vector.load %arg2[%c0_11, %c1, %c0_12, %c0_13, %c0_14] : memref<1x4x4x17x128xbf16, #tpu.memory_space<vmem>>, vector<1x1x4x16x128xbf16>
    %13 = vector.shape_cast %12 : vector<1x1x4x16x128xbf16> to vector<4x16x128xbf16>
    %14 = vector.shape_cast %13 : vector<4x16x128xbf16> to vector<64x128xbf16>
    %c1_15 = arith.constant 1 : index
    %c0_16 = arith.constant 0 : index
    %c0_17 = arith.constant 0 : index
    %15 = vector.load %arg4[%c1_15, %c0_16, %c0_17] : memref<9x128x128xbf16, #tpu.memory_space<vmem>>, vector<1x128x128xbf16>
    %16 = vector.shape_cast %15 : vector<1x128x128xbf16> to vector<128x128xbf16>
    %cst_18 = arith.constant dense<0.000000e+00> : vector<64x128xf32>
    %17 = tpu.matmul %14, %16, %cst_18 {dimension_numbers = #tpu.dot_dimension_numbers<[1], [0], [0], [1], [0, 0, 1, 1], [], []>} : vector<64x128xbf16>, vector<128x128xbf16>, vector<64x128xf32> -> vector<64x128xf32>
    %c0_19 = arith.constant 0 : index
    %c0_20 = arith.constant 0 : index
    %18 = vector.load %arg7[%c0_19, %c0_20] : memref<64x128xf32, #tpu.memory_space<vmem>>, vector<64x128xf32>
    %19 = arith.addf %18, %17 : vector<64x128xf32>
    %c0_21 = arith.constant 0 : index
    %c0_22 = arith.constant 0 : index
    %20 = vector.load %arg7[%c0_21, %c0_22] : memref<64x128xf32, #tpu.memory_space<vmem>>, vector<64x128xf32>
    tpu.vector_store %arg7[%c0_21, %c0_22], %19 {strides = array<i32>} : memref<64x128xf32, #tpu.memory_space<vmem>>, vector<64x128xf32>,
    %c0_23 = arith.constant 0 : index
    %c0_24 = arith.constant 0 : index
    %c0_25 = arith.constant 0 : index
    %c1_26 = arith.constant 1 : index
    %c0_27 = arith.constant 0 : index
    %21 = vector.load %arg2[%c0_23, %c0_24, %c0_25, %c1_26, %c0_27] : memref<1x4x4x17x128xbf16, #tpu.memory_space<vmem>>, vector<1x1x4x16x128xbf16>
    %22 = vector.shape_cast %21 : vector<1x1x4x16x128xbf16> to vector<4x16x128xbf16>
    %23 = vector.shape_cast %22 : vector<4x16x128xbf16> to vector<64x128xbf16>
    %c2 = arith.constant 2 : index
    %c0_28 = arith.constant 0 : index
    %c0_29 = arith.constant 0 : index
    %24 = vector.load %arg4[%c2, %c0_28, %c0_29] : memref<9x128x128xbf16, #tpu.memory_space<vmem>>, vector<1x128x128xbf16>
    %25 = vector.shape_cast %24 : vector<1x128x128xbf16> to vector<128x128xbf16>
    %cst_30 = arith.constant dense<0.000000e+00> : vector<64x128xf32>
    %26 = tpu.matmul %23, %25, %cst_30 {dimension_numbers = #tpu.dot_dimension_numbers<[1], [0], [0], [1], [0, 0, 1, 1], [], []>} : vector<64x128xbf16>, vector<128x128xbf16>, vector<64x128xf32> -> vector<64x128xf32>
    %c0_31 = arith.constant 0 : index
    %c0_32 = arith.constant 0 : index
    %27 = vector.load %arg7[%c0_31, %c0_32] : memref<64x128xf32, #tpu.memory_space<vmem>>, vector<64x128xf32>
    %28 = arith.addf %27, %26 : vector<64x128xf32>
    %c0_33 = arith.constant 0 : index
    %c0_34 = arith.constant 0 : index
    %29 = vector.load %arg7[%c0_33, %c0_34] : memref<64x128xf32, #tpu.memory_space<vmem>>, vector<64x128xf32>
    tpu.vector_store %arg7[%c0_33, %c0_34], %28 {strides = array<i32>} : memref<64x128xf32, #tpu.memory_space<vmem>>, vector<64x128xf32>,
    %c0_35 = arith.constant 0 : index
    %c2_36 = arith.constant 2 : index
    %c0_37 = arith.constant 0 : index
    %c0_38 = arith.constant 0 : index
    %c0_39 = arith.constant 0 : index
    %30 = vector.load %arg2[%c0_35, %c2_36, %c0_37, %c0_38, %c0_39] : memref<1x4x4x17x128xbf16, #tpu.memory_space<vmem>>, vector<1x1x4x16x128xbf16>
    %31 = vector.shape_cast %30 : vector<1x1x4x16x128xbf16> to vector<4x16x128xbf16>
    %32 = vector.shape_cast %31 : vector<4x16x128xbf16> to vector<64x128xbf16>
    %c3 = arith.constant 3 : index
    %c0_40 = arith.constant 0 : index
    %c0_41 = arith.constant 0 : index
    %33 = vector.load %arg4[%c3, %c0_40, %c0_41] : memref<9x128x128xbf16, #tpu.memory_space<vmem>>, vector<1x128x128xbf16>
    %34 = vector.shape_cast %33 : vector<1x128x128xbf16> to vector<128x128xbf16>
    %cst_42 = arith.constant dense<0.000000e+00> : vector<64x128xf32>
    %35 = tpu.matmul %32, %34, %cst_42 {dimension_numbers = #tpu.dot_dimension_numbers<[1], [0], [0], [1], [0, 0, 1, 1], [], []>} : vector<64x128xbf16>, vector<128x128xbf16>, vector<64x128xf32> -> vector<64x128xf32>
    %c0_43 = arith.constant 0 : index
    %c0_44 = arith.constant 0 : index
    %36 = vector.load %arg7[%c0_43, %c0_44] : memref<64x128xf32, #tpu.memory_space<vmem>>, vector<64x128xf32>
    %37 = arith.addf %36, %35 : vector<64x128xf32>
    %c0_45 = arith.constant 0 : index
    %c0_46 = arith.constant 0 : index
    %38 = vector.load %arg7[%c0_45, %c0_46] : memref<64x128xf32, #tpu.memory_space<vmem>>, vector<64x128xf32>
    tpu.vector_store %arg7[%c0_45, %c0_46], %37 {strides = array<i32>} : memref<64x128xf32, #tpu.memory_space<vmem>>, vector<64x128xf32>,
    %c0_47 = arith.constant 0 : index
    %c3_48 = arith.constant 3 : index
    %c0_49 = arith.constant 0 : index
    %c0_50 = arith.constant 0 : index
    %c0_51 = arith.constant 0 : index
    %39 = vector.load %arg2[%c0_47, %c3_48, %c0_49, %c0_50, %c0_51] : memref<1x4x4x17x128xbf16, #tpu.memory_space<vmem>>, vector<1x1x4x16x128xbf16>
    %40 = vector.shape_cast %39 : vector<1x1x4x16x128xbf16> to vector<4x16x128xbf16>
    %41 = vector.shape_cast %40 : vector<4x16x128xbf16> to vector<64x128xbf16>
    %c4 = arith.constant 4 : index
    %c0_52 = arith.constant 0 : index
    %c0_53 = arith.constant 0 : index
    %42 = vector.load %arg4[%c4, %c0_52, %c0_53] : memref<9x128x128xbf16, #tpu.memory_space<vmem>>, vector<1x128x128xbf16>
    %43 = vector.shape_cast %42 : vector<1x128x128xbf16> to vector<128x128xbf16>
    %cst_54 = arith.constant dense<0.000000e+00> : vector<64x128xf32>
    %44 = tpu.matmul %41, %43, %cst_54 {dimension_numbers = #tpu.dot_dimension_numbers<[1], [0], [0], [1], [0, 0, 1, 1], [], []>} : vector<64x128xbf16>, vector<128x128xbf16>, vector<64x128xf32> -> vector<64x128xf32>
    %c0_55 = arith.constant 0 : index
    %c0_56 = arith.constant 0 : index
    %45 = vector.load %arg7[%c0_55, %c0_56] : memref<64x128xf32, #tpu.memory_space<vmem>>, vector<64x128xf32>
    %46 = arith.addf %45, %44 : vector<64x128xf32>
    %c0_57 = arith.constant 0 : index
    %c0_58 = arith.constant 0 : index
    %47 = vector.load %arg7[%c0_57, %c0_58] : memref<64x128xf32, #tpu.memory_space<vmem>>, vector<64x128xf32>
    tpu.vector_store %arg7[%c0_57, %c0_58], %46 {strides = array<i32>} : memref<64x128xf32, #tpu.memory_space<vmem>>, vector<64x128xf32>,
    %c0_59 = arith.constant 0 : index
    %c2_60 = arith.constant 2 : index
    %c0_61 = arith.constant 0 : index
    %c1_62 = arith.constant 1 : index
    %c0_63 = arith.constant 0 : index
    %48 = vector.load %arg2[%c0_59, %c2_60, %c0_61, %c1_62, %c0_63] : memref<1x4x4x17x128xbf16, #tpu.memory_space<vmem>>, vector<1x1x4x16x128xbf16>
    %49 = vector.shape_cast %48 : vector<1x1x4x16x128xbf16> to vector<4x16x128xbf16>
    %50 = vector.shape_cast %49 : vector<4x16x128xbf16> to vector<64x128xbf16>
    %c5 = arith.constant 5 : index
    %c0_64 = arith.constant 0 : index
    %c0_65 = arith.constant 0 : index
    %51 = vector.load %arg4[%c5, %c0_64, %c0_65] : memref<9x128x128xbf16, #tpu.memory_space<vmem>>, vector<1x128x128xbf16>
    %52 = vector.shape_cast %51 : vector<1x128x128xbf16> to vector<128x128xbf16>
    %cst_66 = arith.constant dense<0.000000e+00> : vector<64x128xf32>
    %53 = tpu.matmul %50, %52, %cst_66 {dimension_numbers = #tpu.dot_dimension_numbers<[1], [0], [0], [1], [0, 0, 1, 1], [], []>} : vector<64x128xbf16>, vector<128x128xbf16>, vector<64x128xf32> -> vector<64x128xf32>
    %c0_67 = arith.constant 0 : index
    %c0_68 = arith.constant 0 : index
    %54 = vector.load %arg7[%c0_67, %c0_68] : memref<64x128xf32, #tpu.memory_space<vmem>>, vector<64x128xf32>
    %55 = arith.addf %54, %53 : vector<64x128xf32>
    %c0_69 = arith.constant 0 : index
    %c0_70 = arith.constant 0 : index
    %56 = vector.load %arg7[%c0_69, %c0_70] : memref<64x128xf32, #tpu.memory_space<vmem>>, vector<64x128xf32>
    tpu.vector_store %arg7[%c0_69, %c0_70], %55 {strides = array<i32>} : memref<64x128xf32, #tpu.memory_space<vmem>>, vector<64x128xf32>,
    %c0_71 = arith.constant 0 : index
    %c0_72 = arith.constant 0 : index
    %c1_73 = arith.constant 1 : index
    %c0_74 = arith.constant 0 : index
    %c0_75 = arith.constant 0 : index
    %57 = vector.load %arg2[%c0_71, %c0_72, %c1_73, %c0_74, %c0_75] : memref<1x4x4x17x128xbf16, #tpu.memory_space<vmem>>, vector<1x1x3x16x128xbf16>
    %58 = vector.shape_cast %57 : vector<1x1x3x16x128xbf16> to vector<3x16x128xbf16>
    %c0_76 = arith.constant 0 : index
    %c0_77 = arith.constant 0 : index
    %59 = vector.load %arg7[%c0_76, %c0_77] : memref<64x128xf32, #tpu.memory_space<vmem>>, vector<48x128xf32>
    %60 = vector.shape_cast %58 : vector<3x16x128xbf16> to vector<48x128xbf16>
    %c6 = arith.constant 6 : index
    %c0_78 = arith.constant 0 : index
    %c0_79 = arith.constant 0 : index
    %61 = vector.load %arg4[%c6, %c0_78, %c0_79] : memref<9x128x128xbf16, #tpu.memory_space<vmem>>, vector<1x128x128xbf16>
    %62 = vector.shape_cast %61 : vector<1x128x128xbf16> to vector<128x128xbf16>
    %cst_80 = arith.constant dense<0.000000e+00> : vector<48x128xf32>
    %63 = tpu.matmul %60, %62, %cst_80 {dimension_numbers = #tpu.dot_dimension_numbers<[1], [0], [0], [1], [0, 0, 1, 1], [], []>} : vector<48x128xbf16>, vector<128x128xbf16>, vector<48x128xf32> -> vector<48x128xf32>
    %64 = arith.addf %59, %63 : vector<48x128xf32>
    %c0_81 = arith.constant 0 : index
    %c0_82 = arith.constant 0 : index
    %65 = vector.load %arg7[%c0_81, %c0_82] : memref<64x128xf32, #tpu.memory_space<vmem>>, vector<48x128xf32>
    tpu.vector_store %arg7[%c0_81, %c0_82], %64 {strides = array<i32>} : memref<64x128xf32, #tpu.memory_space<vmem>>, vector<48x128xf32>,
    %c0_83 = arith.constant 0 : index
    %c0_84 = arith.constant 0 : index
    %c0_85 = arith.constant 0 : index
    %c0_86 = arith.constant 0 : index
    %c0_87 = arith.constant 0 : index
    %66 = vector.load %arg3[%c0_83, %c0_84, %c0_85, %c0_86, %c0_87] : memref<1x2x1x17x128xbf16, #tpu.memory_space<vmem>>, vector<1x1x1x16x128xbf16>
    %67 = vector.shape_cast %66 : vector<1x1x1x16x128xbf16> to vector<16x128xbf16>
    %c48 = arith.constant 48 : index
    %c0_88 = arith.constant 0 : index
    %68 = vector.load %arg7[%c48, %c0_88] : memref<64x128xf32, #tpu.memory_space<vmem>>, vector<16x128xf32>
    %c6_89 = arith.constant 6 : index
    %c0_90 = arith.constant 0 : index
    %c0_91 = arith.constant 0 : index
    %69 = vector.load %arg4[%c6_89, %c0_90, %c0_91] : memref<9x128x128xbf16, #tpu.memory_space<vmem>>, vector<1x128x128xbf16>
    %70 = vector.shape_cast %69 : vector<1x128x128xbf16> to vector<128x128xbf16>
    %cst_92 = arith.constant dense<0.000000e+00> : vector<16x128xf32>
    %71 = tpu.matmul %67, %70, %cst_92 {dimension_numbers = #tpu.dot_dimension_numbers<[1], [0], [0], [1], [0, 0, 1, 1], [], []>} : vector<16x128xbf16>, vector<128x128xbf16>, vector<16x128xf32> -> vector<16x128xf32>
    %72 = arith.addf %68, %71 : vector<16x128xf32>
    %c48_93 = arith.constant 48 : index
    %c0_94 = arith.constant 0 : index
    %73 = vector.load %arg7[%c48_93, %c0_94] : memref<64x128xf32, #tpu.memory_space<vmem>>, vector<16x128xf32>
    tpu.vector_store %arg7[%c48_93, %c0_94], %72 {strides = array<i32>} : memref<64x128xf32, #tpu.memory_space<vmem>>, vector<16x128xf32>,
    %c0_95 = arith.constant 0 : index
    %c1_96 = arith.constant 1 : index
    %c1_97 = arith.constant 1 : index
    %c0_98 = arith.constant 0 : index
    %c0_99 = arith.constant 0 : index
    %74 = vector.load %arg2[%c0_95, %c1_96, %c1_97, %c0_98, %c0_99] : memref<1x4x4x17x128xbf16, #tpu.memory_space<vmem>>, vector<1x1x3x16x128xbf16>
    %75 = vector.shape_cast %74 : vector<1x1x3x16x128xbf16> to vector<3x16x128xbf16>
    %c0_100 = arith.constant 0 : index
    %c0_101 = arith.constant 0 : index
    %76 = vector.load %arg7[%c0_100, %c0_101] : memref<64x128xf32, #tpu.memory_space<vmem>>, vector<48x128xf32>
    %77 = vector.shape_cast %75 : vector<3x16x128xbf16> to vector<48x128xbf16>
    %c7 = arith.constant 7 : index
    %c0_102 = arith.constant 0 : index
    %c0_103 = arith.constant 0 : index
    %78 = vector.load %arg4[%c7, %c0_102, %c0_103] : memref<9x128x128xbf16, #tpu.memory_space<vmem>>, vector<1x128x128xbf16>
    %79 = vector.shape_cast %78 : vector<1x128x128xbf16> to vector<128x128xbf16>
    %cst_104 = arith.constant dense<0.000000e+00> : vector<48x128xf32>
    %80 = tpu.matmul %77, %79, %cst_104 {dimension_numbers = #tpu.dot_dimension_numbers<[1], [0], [0], [1], [0, 0, 1, 1], [], []>} : vector<48x128xbf16>, vector<128x128xbf16>, vector<48x128xf32> -> vector<48x128xf32>
    %81 = arith.addf %76, %80 : vector<48x128xf32>
    %c0_105 = arith.constant 0 : index
    %c0_106 = arith.constant 0 : index
    %82 = vector.load %arg7[%c0_105, %c0_106] : memref<64x128xf32, #tpu.memory_space<vmem>>, vector<48x128xf32>
    tpu.vector_store %arg7[%c0_105, %c0_106], %81 {strides = array<i32>} : memref<64x128xf32, #tpu.memory_space<vmem>>, vector<48x128xf32>,
    %c0_107 = arith.constant 0 : index
    %c1_108 = arith.constant 1 : index
    %c0_109 = arith.constant 0 : index
    %c0_110 = arith.constant 0 : index
    %c0_111 = arith.constant 0 : index
    %83 = vector.load %arg3[%c0_107, %c1_108, %c0_109, %c0_110, %c0_111] : memref<1x2x1x17x128xbf16, #tpu.memory_space<vmem>>, vector<1x1x1x16x128xbf16>
    %84 = vector.shape_cast %83 : vector<1x1x1x16x128xbf16> to vector<16x128xbf16>
    %c48_112 = arith.constant 48 : index
    %c0_113 = arith.constant 0 : index
    %85 = vector.load %arg7[%c48_112, %c0_113] : memref<64x128xf32, #tpu.memory_space<vmem>>, vector<16x128xf32>
    %c7_114 = arith.constant 7 : index
    %c0_115 = arith.constant 0 : index
    %c0_116 = arith.constant 0 : index
    %86 = vector.load %arg4[%c7_114, %c0_115, %c0_116] : memref<9x128x128xbf16, #tpu.memory_space<vmem>>, vector<1x128x128xbf16>
    %87 = vector.shape_cast %86 : vector<1x128x128xbf16> to vector<128x128xbf16>
    %cst_117 = arith.constant dense<0.000000e+00> : vector<16x128xf32>
    %88 = tpu.matmul %84, %87, %cst_117 {dimension_numbers = #tpu.dot_dimension_numbers<[1], [0], [0], [1], [0, 0, 1, 1], [], []>} : vector<16x128xbf16>, vector<128x128xbf16>, vector<16x128xf32> -> vector<16x128xf32>
    %89 = arith.addf %85, %88 : vector<16x128xf32>
    %c48_118 = arith.constant 48 : index
    %c0_119 = arith.constant 0 : index
    %90 = vector.load %arg7[%c48_118, %c0_119] : memref<64x128xf32, #tpu.memory_space<vmem>>, vector<16x128xf32>
    tpu.vector_store %arg7[%c48_118, %c0_119], %89 {strides = array<i32>} : memref<64x128xf32, #tpu.memory_space<vmem>>, vector<16x128xf32>,
    %c0_120 = arith.constant 0 : index
    %c0_121 = arith.constant 0 : index
    %c1_122 = arith.constant 1 : index
    %c1_123 = arith.constant 1 : index
    %c0_124 = arith.constant 0 : index
    %91 = vector.load %arg2[%c0_120, %c0_121, %c1_122, %c1_123, %c0_124] : memref<1x4x4x17x128xbf16, #tpu.memory_space<vmem>>, vector<1x1x3x16x128xbf16>
    %92 = vector.shape_cast %91 : vector<1x1x3x16x128xbf16> to vector<3x16x128xbf16>
    %c0_125 = arith.constant 0 : index
    %c0_126 = arith.constant 0 : index
    %93 = vector.load %arg7[%c0_125, %c0_126] : memref<64x128xf32, #tpu.memory_space<vmem>>, vector<48x128xf32>
    %94 = vector.shape_cast %92 : vector<3x16x128xbf16> to vector<48x128xbf16>
    %c8 = arith.constant 8 : index
    %c0_127 = arith.constant 0 : index
    %c0_128 = arith.constant 0 : index
    %95 = vector.load %arg4[%c8, %c0_127, %c0_128] : memref<9x128x128xbf16, #tpu.memory_space<vmem>>, vector<1x128x128xbf16>
    %96 = vector.shape_cast %95 : vector<1x128x128xbf16> to vector<128x128xbf16>
    %cst_129 = arith.constant dense<0.000000e+00> : vector<48x128xf32>
    %97 = tpu.matmul %94, %96, %cst_129 {dimension_numbers = #tpu.dot_dimension_numbers<[1], [0], [0], [1], [0, 0, 1, 1], [], []>} : vector<48x128xbf16>, vector<128x128xbf16>, vector<48x128xf32> -> vector<48x128xf32>
    %98 = arith.addf %93, %97 : vector<48x128xf32>
    %c0_130 = arith.constant 0 : index
    %c0_131 = arith.constant 0 : index
    %99 = vector.load %arg7[%c0_130, %c0_131] : memref<64x128xf32, #tpu.memory_space<vmem>>, vector<48x128xf32>
    tpu.vector_store %arg7[%c0_130, %c0_131], %98 {strides = array<i32>} : memref<64x128xf32, #tpu.memory_space<vmem>>, vector<48x128xf32>,
    %c0_132 = arith.constant 0 : index
    %c0_133 = arith.constant 0 : index
    %c0_134 = arith.constant 0 : index
    %c1_135 = arith.constant 1 : index
    %c0_136 = arith.constant 0 : index
    %100 = vector.load %arg3[%c0_132, %c0_133, %c0_134, %c1_135, %c0_136] : memref<1x2x1x17x128xbf16, #tpu.memory_space<vmem>>, vector<1x1x1x16x128xbf16>
    %101 = vector.shape_cast %100 : vector<1x1x1x16x128xbf16> to vector<16x128xbf16>
    %c48_137 = arith.constant 48 : index
    %c0_138 = arith.constant 0 : index
    %102 = vector.load %arg7[%c48_137, %c0_138] : memref<64x128xf32, #tpu.memory_space<vmem>>, vector<16x128xf32>
    %c8_139 = arith.constant 8 : index
    %c0_140 = arith.constant 0 : index
    %c0_141 = arith.constant 0 : index
    %103 = vector.load %arg4[%c8_139, %c0_140, %c0_141] : memref<9x128x128xbf16, #tpu.memory_space<vmem>>, vector<1x128x128xbf16>
    %104 = vector.shape_cast %103 : vector<1x128x128xbf16> to vector<128x128xbf16>
    %cst_142 = arith.constant dense<0.000000e+00> : vector<16x128xf32>
    %105 = tpu.matmul %101, %104, %cst_142 {dimension_numbers = #tpu.dot_dimension_numbers<[1], [0], [0], [1], [0, 0, 1, 1], [], []>} : vector<16x128xbf16>, vector<128x128xbf16>, vector<16x128xf32> -> vector<16x128xf32>
    %106 = arith.addf %102, %105 : vector<16x128xf32>
    %c48_143 = arith.constant 48 : index
    %c0_144 = arith.constant 0 : index
    %107 = vector.load %arg7[%c48_143, %c0_144] : memref<64x128xf32, #tpu.memory_space<vmem>>, vector<16x128xf32>
    tpu.vector_store %arg7[%c48_143, %c0_144], %106 {strides = array<i32>} : memref<64x128xf32, #tpu.memory_space<vmem>>, vector<16x128xf32>,
    %c0_145 = arith.constant 0 : index
    %c0_146 = arith.constant 0 : index
    %108 = vector.load %arg7[%c0_145, %c0_146] : memref<64x128xf32, #tpu.memory_space<vmem>>, vector<64x128xf32>
    %109 = vector.shape_cast %108 : vector<64x128xf32> to vector<4x16x128xf32>
    %c0_147 = arith.constant 0 : index
    %c0_148 = arith.constant 0 : index
    %c0_149 = arith.constant 0 : index
    %c0_150 = arith.constant 0 : index
    %110 = vector.load %arg6[%c0_147, %c0_148, %c0_149, %c0_150] : memref<1x4x16x128xf32, #tpu.memory_space<vmem>>, vector<1x4x16x128xf32>
    %111 = vector.shape_cast %110 : vector<1x4x16x128xf32> to vector<4x16x128xf32>
    %112 = vector.shape_cast %109 : vector<4x16x128xf32> to vector<1x4x16x128xf32>
    tpu.vector_store %arg6[%c0_147, %c0_148, %c0_149, %c0_150], %112 {strides = array<i32>} : memref<1x4x16x128xf32, #tpu.memory_space<vmem>>, vector<1x4x16x128xf32>,
    return
  }
  func.func @transform_0(%arg0: i32, %arg1: i32) -> (i32, i32, i32, i32, i32) {
    %c0_i32 = arith.constant 0 : i32
    %c0_i32_0 = arith.constant 0 : i32
    %c0_i32_1 = arith.constant 0 : i32
    %c0_i32_2 = arith.constant 0 : i32
    return %arg0, %c0_i32, %arg1, %c0_i32_0, %c0_i32_1 : i32, i32, i32, i32, i32
  }
  func.func @transform_1(%arg0: i32, %arg1: i32) -> (i32, i32, i32, i32, i32) {
    %c1_i32 = arith.constant 1 : i32
    %0 = arith.addi %arg1, %c1_i32 : i32
    %c4_i32 = arith.constant 4 : i32
    %1 = arith.muli %0, %c4_i32 : i32
    %c0_i32 = arith.constant 0 : i32
    %c0_i32_0 = arith.constant 0 : i32
    %c0_i32_1 = arith.constant 0 : i32
    %c0_i32_2 = arith.constant 0 : i32
    return %arg0, %c0_i32, %1, %c0_i32_0, %c0_i32_1 : i32, i32, i32, i32, i32
  }
  func.func @transform_2(%arg0: i32, %arg1: i32) -> (i32, i32, i32) {
    %c0_i32 = arith.constant 0 : i32
    %c0_i32_0 = arith.constant 0 : i32
    %c0_i32_1 = arith.constant 0 : i32
    %c0_i32_2 = arith.constant 0 : i32
    return %c0_i32, %c0_i32_0, %c0_i32_1 : i32, i32, i32
  }
  func.func @transform_3(%arg0: i32, %arg1: i32) -> (i32, i32) {
    %c0_i32 = arith.constant 0 : i32
    %c0_i32_0 = arith.constant 0 : i32
    %c0_i32_1 = arith.constant 0 : i32
    return %c0_i32, %c0_i32_0 : i32, i32
  }
  func.func @transform_4(%arg0: i32, %arg1: i32) -> (i32, i32, i32, i32) {
    %c0_i32 = arith.constant 0 : i32
    %c0_i32_0 = arith.constant 0 : i32
    %c0_i32_1 = arith.constant 0 : i32
    return %arg0, %arg1, %c0_i32, %c0_i32_0 : i32, i32, i32, i32
  }
}

</mosaic_0001>

<bundles_post_ra>
// kernel: tpu_custom_call.1
= control target key start
LH: loop header
LB: loop body
LE: loop exit
PB: predicated region body
PF: predicated region fallthrough
CT: control target
= control target key end

     0   :  { %s4670_s0 = inlined_call_operand.vmem [shape: bf16[2,4,9,17,128], index: 0, kind: input, shape index: {}]   ;;  %s4671_s1 = inlined_call_operand.vmem [shape: bf16[2,4,9,17,128], index: 1, kind: input, shape index: {}]   ;;  %s4672_s2 = inlined_call_operand.vmem [shape: bf16[9,128,128], index: 2, kind: input, shape index: {}]   ;;  %s4673_s3 = inlined_call_operand.vmem [shape: f32[1,128], index: 3, kind: input, shape index: {}]   ;;  %s4674_s4 = inlined_call_operand.hbm [shape: f32[2,8,16,128], index: 4, kind: output, shape index: {}]  }
   0x1   :  { %4678 = sst [smem:[#allocation13_spill]] %s4670_s0 }
   0x2   :  { %9 = vsyncpa [#allocation6], 0 }
   0x3   :  { %11 = vsyncpa [#allocation6 + $0x1], 0  ;;  %s3905_s15 = smov 0   ;;  %s3907_s16 = smov 0  }
   0x4   :  { %s3909_s17 = smov 0   ;;  %s3911_s18 = smov 0  }
   0x5   :  { %s3913_s19 = smov 0   ;;  %s3915_s20 = smov 0  }
   0x6   :  { %s3917_s21 = smov 0   ;;  %s3919_s22 = smov 0  }
   0x7   :  { %s3921_s23 = smov 0   ;;  %s3923_s24 = smov 0  }
   0x8 LB: > { %4679 = sst [smem:[#allocation8_spill]] %s3824_s19  ;;  %s2644_s25 = sadd.s32 4294967295, %s3844_s24   ;;  %s3844_s24 = sphi %s3923_s24, %s17_s24   ;;  %s3840_s23 = sphi %s3921_s23, %s4710_s23   ;;  %s3836_s22 = sphi %s3919_s22, %s4709_s22   ;;  %s3832_s21 = sphi %s3917_s21, %s4708_s21   ;;  %s3828_s20 = sphi %s3915_s20, %s4707_s20   ;;  %s3824_s19 = sphi %s3913_s19, %s4700_s19   ;;  %s3820_s18 = sphi %s3911_s18, %s4706_s18   ;;  %s3816_s17 = sphi %s3909_s17, %s4705_s17   ;;  %s3812_s16 = sphi %s3907_s16, %s4704_s16   ;;  %s3808_s15 = sphi %s3905_s15, %s4703_s15  }
   0x9   : > { %s26_s27 = sadd.s32 1, %s3836_s22  ;;  %s29_s28 = sadd.s32 1, %s3840_s23 }
   0xa   : > { %p27_p0 = scmp.ge.s32.totalorder %s26_s27, 2  ;;  %s38_s29 = sadd.s32 1, %s3824_s19 }
   0xb   : > { %p45_p1 = scmp.ne.s32.totalorder %s3824_s19, %s3820_s18  ;;  %p46_p2 = scmp.eq.s32.totalorder %s3844_s24, 0 }
   0xc   : > { %s4712_s27 = smov (%p27_p0, %s26_s27), 0  ;;  %s4714_s28 = smov (!%p27_p0, %s29_s28), %s3840_s23 }
   0xd   : > { %4680 = sst [smem:[#allocation9_spill]] %s4712_s27  ;;  %s34_s30 = ssub.s32 %s3836_s22, %s4712_s27 }
   0xe   : > { %p3973_p3 = por %p46_p2, %p45_p1  ;;  %p31_p4 = scmp.ge.s32.totalorder %s4714_s28, 2 }
   0xf   : > { %s3401_s6 = sshll.u32 %s3836_s22, 2  ;;  %s3403_s8 = sshll.u32 %s4712_s27, 2 }
  0x10   : > { %s3402_s7 = sadd.s32 4, %s3401_s6  ;;  %s4716_s28 = smov (%p31_p4, %s4714_s28), 0 }
  0x11   : > { %4682 = sst [smem:[#allocation10_spill]] %s4716_s28  ;;  %s3404_s9 = sadd.s32 4, %s3403_s8 }
  0x12   : > { %s70_s10 = sadd.s32 1, %s3816_s17  ;;  %s33_s11 = ssub.s32 %s3840_s23, %s4716_s28 }
  0x13   : > { %s66_s12 = ssub.s32 %s3402_s7, %s3404_s9  ;;  %s35_s13 = sor.u32 %s34_s30, %s33_s11 }
  0x14   : > { %s67_s14 = sor.u32 %s66_s12, %s33_s11  ;;  %p36_p5 = scmp.eq.s32.totalorder %s35_s13, 0 }
  0x15   : > { %p68_p6 = scmp.eq.s32.totalorder %s67_s14, 0  ;;  %p77_p7 = scmp.ne.s32.totalorder %s3816_s17, %s3812_s16 }
  0x16   : > { %p151_p8 = scmp.eq.s32.totalorder %s2644_s25, 3  ;;  %p156_p11 = scmp.ne.s32.totalorder %s3820_s18, %s3808_s15 }
  0x17   : > { %s3987_s6 = scalar_select %p36_p5, %s3824_s19, %s38_s29  }
  0x18   : > { %s3990_s26 = scalar_select %p68_p6, %s3816_s17, %s70_s10  }
  0x19   : > { %4683 = sst [smem:[#allocation11_spill]] %s3987_s6  ;;  %p3994_p9 = por %p77_p7, %p46_p2 }
  0x1a   : > { %4684 = sst [smem:[#allocation12_spill]] %s3990_s26  ;;  %p4001_p10 = por %p151_p8, %p45_p1 }
  0x1b   : > { %s4687_s30 = sadd.s32 4294967294, %s3844_s24   ;;  %p2649_p0 = scmp.ge.s32.totalorder %s3844_s24, 4 }
  0x1c   : > { %p157_p12 = scmp.eq.s32.totalorder %s4687_s30, 3 }
  0x1d   : > { %179 = sbr.rel (%p2649_p0) target bundleno = 98 (0x62), region = 24 }
  0x1e   : > { %p4009_p13 = por %p157_p12, %p156_p11 }
  0x22   : > { %182 = sbr.rel (!%p3973_p3) target bundleno = 85 (0x55), region = 28  ;;  %s184_s25 = sand.u32 (%p3973_p3), 1, %s3824_s19  }
  0x23   : > { %s3537_s29 = smul.u32 (%p3973_p3), 192, %s184_s25  ;;  %s4689_s0 = sld [smem:[#allocation13_spill]] (%p3973_p3) }
  0x24   : > { %s3538_s9 = smul.u32 (%p3973_p3), 12, %s3836_s22  ;;  %s4032_s26 = smov (%p3973_p3), 0  }
  0x25   : > { %s3539_s10 = smul.u32 (%p3973_p3), 108, %s3840_s23  ;;  %s4024_s28 = scalar_lea.vmem (%p3973_p3), [#allocation3], %s3537_s29  }
  0x26   : > { %s4690_s5 = smov (%p3973_p3), %s4024_s28  ;;  %s4034_s25 = smov (%p3973_p3), 0  }
  0x27   : > { %s196_s11 = sadd.s32 %s3539_s10, %s3538_s9 }
  0x28   : > { %s2655_s12 = sshll.u32 %s196_s11, 2 }
  0x29   : > { %s4022_s30 = scalar_lea.vmem %s4689_s0, %s2655_s12  }
  0x2a   : > { %s4691_s6 = smov %s4022_s30 }
  0x2b LB: >> { %v219_v0 = vld [vmem:[%s3852_s6] sm:$0xf]  ;;  %v221_v1 = vld [vmem:[%s3852_s6 + $0x4] sm:$0xf]  ;;  %v223_v2 = vld [vmem:[%s3852_s6 + $0x8] sm:$0xf]  ;;  %s3860_s25 = sphi %s4034_s25, %s213_s25   ;;  %s3856_s26 = sphi %s4032_s26, %s4694_s26   ;;  %s3852_s6 = sphi %s4691_s6, %s4693_s6   ;;  %s3848_s5 = sphi %s4690_s5, %s4692_s5  }
  0x2c   : >> { %220 = vst [vmem:[%s3848_s5] sm:$0xf] %v219_v0  ;;  %v225_v3 = vld [vmem:[%s3852_s6 + $0xc] sm:$0xf]  ;;  %v227_v4 = vld [vmem:[%s3852_s6 + $0x10] sm:$0xf]  ;;  %s283_s29 = sadd.s32 1, %s3856_s26 }
  0x2d   : >> { %222 = vst [vmem:[%s3848_s5 + $0x4] sm:$0xf] %v221_v1  ;;  %v229_v5 = vld [vmem:[%s3852_s6 + $0x14] sm:$0xf]  ;;  %v231_v6 = vld [vmem:[%s3852_s6 + $0x18] sm:$0xf] }
  0x2e   : >> { %224 = vst [vmem:[%s3848_s5 + $0x8] sm:$0xf] %v223_v2  ;;  %v233_v7 = vld [vmem:[%s3852_s6 + $0x1c] sm:$0xf]  ;;  %v235_v8 = vld [vmem:[%s3852_s6 + $0x6c] sm:$0xf] }
  0x2f   : >> { %226 = vst [vmem:[%s3848_s5 + $0xc] sm:$0xf] %v225_v3  ;;  %v237_v9 = vld [vmem:[%s3852_s6 + $0x70] sm:$0xf]  ;;  %v239_v10 = vld [vmem:[%s3852_s6 + $0x74] sm:$0xf] }
  0x30   : >> { %228 = vst [vmem:[%s3848_s5 + $0x10] sm:$0xf] %v227_v4  ;;  %v241_v11 = vld [vmem:[%s3852_s6 + $0x78] sm:$0xf]  ;;  %v243_v12 = vld [vmem:[%s3852_s6 + $0x7c] sm:$0xf] }
  0x31   : >> { %230 = vst [vmem:[%s3848_s5 + $0x14] sm:$0xf] %v229_v5  ;;  %v245_v13 = vld [vmem:[%s3852_s6 + $0x80] sm:$0xf]  ;;  %p284_p1 = scmp.ge.s32.totalorder %s283_s29, 1  ;;  %s213_s25 = sadd.s32 1, %s3860_s25  }
  0x32   : >> { %232 = vst [vmem:[%s3848_s5 + $0x18] sm:$0xf] %v231_v6  ;;  %v247_v14 = vld [vmem:[%s3852_s6 + $0x84] sm:$0xf]  ;;  %v249_v15 = vld [vmem:[%s3852_s6 + $0x88] sm:$0xf] }
  0x33   : >> { %234 = vst [vmem:[%s3848_s5 + $0x1c] sm:$0xf] %v233_v7  ;;  %v251_v16 = vld [vmem:[%s3852_s6 + $0xd8] sm:$0xf]  ;;  %v253_v17 = vld [vmem:[%s3852_s6 + $0xdc] sm:$0xf] }
  0x34   : >> { %236 = vst [vmem:[%s3848_s5 + $0x30] sm:$0xf] %v235_v8  ;;  %s4718_s29 = smov (%p284_p1, %s283_s29), 0  ;;  %v255_v18 = vld [vmem:[%s3852_s6 + $0xe0] sm:$0xf]  ;;  %p212_p2 = scmp.ge.s32.totalorder %s213_s25, 1 }
  0x35   : >> { %238 = vst [vmem:[%s3848_s5 + $0x34] sm:$0xf] %v237_v9  ;;  %v257_v19 = vld [vmem:[%s3852_s6 + $0xe4] sm:$0xf]  ;;  %s2658_s26 = sshll.u32 %s4718_s29, 5  ;;  %s294_s11 = scalar_lea.vmem (%p212_p2), %s4022_s30, 32  }
  0x36   : >> { %240 = vst [vmem:[%s3848_s5 + $0x38] sm:$0xf] %v239_v10  ;;  %v259_v20 = vld [vmem:[%s3852_s6 + $0xe8] sm:$0xf]  ;;  %s4092_s9 = scalar_lea.vmem %s4022_s30, %s2658_s26   ;;  %s289_s10 = scalar_lea.vmem %s4024_s28, %s2658_s26 [#allocation3]   ;;  %v261_v21 = vld [vmem:[%s3852_s6 + $0xec] sm:$0xf] }
  0x37   : >> { %242 = vst [vmem:[%s3848_s5 + $0x3c] sm:$0xf] %v241_v11  ;;  %v263_v22 = vld [vmem:[%s3852_s6 + $0xf0] sm:$0xf]  ;;  %v265_v23 = vld [vmem:[%s3852_s6 + $0xf4] sm:$0xf]  ;;  %s4694_s26 = smov %s4718_s29 }
  0x38   : >> { %244 = vst [vmem:[%s3848_s5 + $0x40] sm:$0xf] %v243_v12  ;;  %v267_v24 = vld [vmem:[%s3852_s6 + $0x144] sm:$0xf]  ;;  %v269_v25 = vld [vmem:[%s3852_s6 + $0x148] sm:$0xf] }
  0x39   : >> { %246 = vst [vmem:[%s3848_s5 + $0x44] sm:$0xf] %v245_v13  ;;  %v271_v26 = vld [vmem:[%s3852_s6 + $0x14c] sm:$0xf]  ;;  %v273_v27 = vld [vmem:[%s3852_s6 + $0x150] sm:$0xf] }
  0x3a   : >> { %248 = vst [vmem:[%s3848_s5 + $0x48] sm:$0xf] %v247_v14  ;;  %v275_v28 = vld [vmem:[%s3852_s6 + $0x154] sm:$0xf]  ;;  %v277_v29 = vld [vmem:[%s3852_s6 + $0x158] sm:$0xf] }
  0x3b   : >> { %250 = vst [vmem:[%s3848_s5 + $0x4c] sm:$0xf] %v249_v15  ;;  %v279_v30 = vld [vmem:[%s3852_s6 + $0x15c] sm:$0xf]  ;;  %v281_v31 = vld [vmem:[%s3852_s6 + $0x160] sm:$0xf]  ;;  %s4693_s6 = smov %s4092_s9 }
  0x3c   : >> { %252 = vst [vmem:[%s3848_s5 + $0x60] sm:$0xf] %v251_v16  ;;  %s296_s12 = scalar_lea.vmem (%p212_p2), %s4024_s28, 32 [#allocation3]   ;;  %s4137_s13 = smov (%p212_p2), 0  }
  0x3d   : >> { %254 = vst [vmem:[%s3848_s5 + $0x64] sm:$0xf] %v253_v17  ;;  %s4139_s14 = smov (%p212_p2), 0  }
  0x3e   : >> { %256 = vst [vmem:[%s3848_s5 + $0x68] sm:$0xf] %v255_v18 }
  0x3f   : >> { %258 = vst [vmem:[%s3848_s5 + $0x6c] sm:$0xf] %v257_v19 }
  0x40   : >> { %260 = vst [vmem:[%s3848_s5 + $0x70] sm:$0xf] %v259_v20 }
  0x41   : >> { %262 = vst [vmem:[%s3848_s5 + $0x74] sm:$0xf] %v261_v21 }
  0x42   : >> { %264 = vst [vmem:[%s3848_s5 + $0x78] sm:$0xf] %v263_v22 }
  0x43   : >> { %266 = vst [vmem:[%s3848_s5 + $0x7c] sm:$0xf] %v265_v23 }
  0x44   : >> { %268 = vst [vmem:[%s3848_s5 + $0x90] sm:$0xf] %v267_v24 }
  0x45   : >> { %270 = vst [vmem:[%s3848_s5 + $0x94] sm:$0xf] %v269_v25 }
  0x46   : >> { %272 = vst [vmem:[%s3848_s5 + $0x98] sm:$0xf] %v271_v26 }
  0x47   : >> { %274 = vst [vmem:[%s3848_s5 + $0x9c] sm:$0xf] %v273_v27  ;;  %215 = sbr.rel (!%p212_p2) target bundleno = 43 (0x2b), region = 215 }
  0x48   : >> { %276 = vst [vmem:[%s3848_s5 + $0xa0] sm:$0xf] %v275_v28 }
  0x49   : >> { %278 = vst [vmem:[%s3848_s5 + $0xa4] sm:$0xf] %v277_v29 }
  0x4a   : >> { %280 = vst [vmem:[%s3848_s5 + $0xa8] sm:$0xf] %v279_v30 }
  0x4b   : >> { %282 = vst [vmem:[%s3848_s5 + $0xac] sm:$0xf] %v281_v31  ;;  %s4692_s5 = smov %s289_s10 }
  0x4c LB: >> { %v306_v32 = vld [vmem:[%s3868_s11] sm:$0xf]  ;;  %v308_v33 = vld [vmem:[%s3868_s11 + $0x6c] sm:$0xf]  ;;  %v310_v34 = vld [vmem:[%s3868_s11 + $0xd8] sm:$0xf]  ;;  %s3876_s14 = sphi %s4139_s14, %s300_s14   ;;  %s3872_s13 = sphi %s4137_s13, %s4695_s13   ;;  %s3868_s11 = sphi %s294_s11, %s3803_s11   ;;  %s3864_s12 = sphi %s296_s12, %s3805_s12  }
  0x4d   : >> { %307 = vst [vmem:[%s3864_s12] sm:$0xf] %v306_v32  ;;  %v312_v35 = vld [vmem:[%s3868_s11 + $0x144] sm:$0xf]  ;;  %s314_s6 = sadd.s32 1, %s3872_s13  ;;  %s300_s14 = sadd.s32 1, %s3876_s14  }
  0x4e   : >> { %309 = vst [vmem:[%s3864_s12 + $0x30] sm:$0xf] %v308_v33  ;;  %p315_p3 = scmp.ge.s32.totalorder %s314_s6, 4  ;;  %p299_p4 = scmp.ge.s32.totalorder %s300_s14, 4 }
  0x4f   : >> { %311 = vst [vmem:[%s3864_s12 + $0x60] sm:$0xf] %v310_v34 }
  0x50   : >> { %313 = vst [vmem:[%s3864_s12 + $0x90] sm:$0xf] %v312_v35  ;;  %s4720_s6 = smov (%p315_p3, %s314_s6), 0  ;;  %302 = sbr.rel (!%p299_p4) target bundleno = 76 (0x4c), region = 226 }
  0x51   : >> { %s2664_s5 = sshll.u32 %s4720_s6, 2  ;;  %s4695_s13 = smov %s4720_s6 }
  0x52   : >> { %s3802_s25 = scalar_lea.vmem %s4022_s30, %s2664_s5   ;;  %s3804_s29 = scalar_lea.vmem %s4024_s28, %s2664_s5 [#allocation3]  }
  0x53   : >> { %s3803_s11 = scalar_lea.vmem %s3802_s25, 32   ;;  %s3805_s12 = scalar_lea.vmem %s3804_s29, 32 [#allocation3]  }
  0x55 PF: > { %481 = sbr.rel (!%p3994_p9) target bundleno = 98 (0x62), region = 90  ;;  %s483_s26 = sand.u32 (%p3994_p9), 1, %s3816_s17  }
  0x56   : > { %s2546_s9 = smul.u32 (%p3994_p9), 12, %s3836_s22 }
  0x57   : > { %s3540_s10 = smul.u32 (%p3994_p9), 24, %s483_s26 }
  0x58   : > { %s2547_s5 = smul.u32 (%p3994_p9), 108, %s3840_s23 }
  0x59   : > { %s485_s28 = scalar_lea.vmem (%p3994_p9), [#allocation4], %s3540_s10 }
  0x5a   : > { %s2548_s25 = sadd.s32 %s2547_s5, %s2546_s9 }
  0x5b   : > { %s2666_s29 = sshll.u32 %s2548_s25, 2 }
  0x5c   : > { %s2550_s6 = scalar_lea.vmem %s4671_s1, %s2666_s29 }
  0x5d   : > { %v2667_v36 = vld [vmem:[%s2550_s6 + $0x30] sm:$0xff]   ;;  %v2669_v37 = vld [vmem:[%s2550_s6 + $0x38] sm:$0xf]  ;;  %v2670_v38 = vld [vmem:[%s2550_s6 + $0x9c] sm:$0xff]  }
  0x5e   : > { %510 = vst [vmem:[%s485_s28] sm:$0xff] %v2667_v36   ;;  %v2672_v39 = vld [vmem:[%s2550_s6 + $0xa4] sm:$0xf] }
  0x5f   : > { %514 = vst [vmem:[%s485_s28 + $0x8] sm:$0xf] %v2669_v37 }
  0x60   : > { %516 = vst [vmem:[%s485_s28 + $0xc] sm:$0xff] %v2670_v38  }
  0x61   : > { %520 = vst [vmem:[%s485_s28 + $0x14] sm:$0xf] %v2672_v39 }
  0x62 PF: > { %p2673_p5 = scmp.ge.s32.totalorder %s3844_s24, 1  ;;  %p555_p6 = scmp.lt.s32.totalorder %s3844_s24, 5 }
  0x64   : > { %p556_p7 = pnand %p2673_p5, %p555_p6 }
  0x65   : > { %s4217_s19 = sand.u32 (!%p556_p7), 1, %s3820_s18   ;;  %s569_s26 = sand.u32 (!%p556_p7), 1, %s3812_s16  }
  0x66   : > { %559 = sbr.rel (%p556_p7) target bundleno = 431 (0x1af), region = 131  ;;  %s2459_s11 = scalar_lea.sflag (!%p556_p7), [#allocation6], %s4217_s19 }
  0x67   : > { %s3541_s9 = smul.u32 (!%p556_p7), 192, %s4217_s19  ;;  %s3717_s5 = scalar_lea.hbm (!%p556_p7), %s4674_s4, 256 }
  0x68   : > { %s3542_s16 = smul.u32 (!%p556_p7), 24, %s569_s26 }
  0x69   : > { %s4247_s14 = scalar_lea.vmem (!%p556_p7), [#allocation3], %s3541_s9  ;;  %s3528_s9 = sshll.u32 (!%p556_p7), %s3828_s20, 3 }
  0x6a   : > { %s4478_s0 = scalar_lea.vmem (!%p556_p7), [#allocation4], %s3542_s16  ;;  %s3397_s16 = sshll.u32 (!%p556_p7), %s3832_s21, 4 }
  0x6b   : > { %v3418_v40 = vld [vmem:[%s4672_s2 + $0x38] sm:$0xff]  ;;  %v3417_v42 = vld [vmem:[%s4672_s2 + $0x30] sm:$0xff]  ;;  %v3416_v46 = vld [vmem:[%s4672_s2 + $0x28] sm:$0xff]  ;;  %vm907_vm0 = vsmask.f32 3328  ;;  %s2471_s29 = sadd.s32 %s3528_s9, %s3397_s16 }
  0x6c   : > { %v3430_v41 = vld [vmem:[%s4672_s2 + $0x78] sm:$0xff]  ;;  %3529 = vmatpush.bf16.msra.mxu2 %v3418_v40  ;;  %v3429_v43 = vld [vmem:[%s4672_s2 + $0x70] sm:$0xff]  ;;  %707 = vmatpush.bf16.msra.mxu0 %v3418_v40  ;;  %v3428_v47 = vld [vmem:[%s4672_s2 + $0x68] sm:$0xff]  ;;  %vm908_vm1 = vsmask.f32 7440  ;;  %s3398_s6 = sshll.u32 %s2471_s29, 3 }
  0x6d   : > { %842 = vmatpush.bf16.msra.mxu1 %v3430_v41  ;;  %v3450_v44 = vld [vmem:[%s4672_s2 + $0xf8] sm:$0xff]  ;;  %v3449_v45 = vld [vmem:[%s4672_s2 + $0xf0] sm:$0xff]  ;;  %v3448_v48 = vld [vmem:[%s4672_s2 + $0xe8] sm:$0xff]  ;;  %vm2362_vm3 = vsmask.f32 7424  ;;  %s2473_s21 = scalar_lea.hbm %s4674_s4, %s3398_s6 }
  0x6e   : > { %1238 = vmatpush.bf16.msra.mxu3 %v3450_v44  ;;  %v3415_v49 = vld [vmem:[%s4672_s2 + $0x20] sm:$0xff]  ;;  %v3414_v52 = vld [vmem:[%s4672_s2 + $0x18] sm:$0xff]  ;;  %v3413_v55 = vld [vmem:[%s4672_s2 + $0x10] sm:$0xff]  ;;  %s2476_s30 = sshll.u32 %s2473_s21, 4  ;;  %s2477_s30 = int_to_ptr.hbm [resolvable:$true] %s2476_s30 }
  0x6f   : > { %v3427_v50 = vld [vmem:[%s4672_s2 + $0x60] sm:$0xff]  ;;  %v3426_v53 = vld [vmem:[%s4672_s2 + $0x58] sm:$0xff]  ;;  %v3425_v56 = vld [vmem:[%s4672_s2 + $0x50] sm:$0xff]  ;;  %s3711_s12 = sshra.s32 %s2477_s30, 4  ;;  %s3712_s12 = int_to_ptr.hbm [resolvable:$true] %s3711_s12 }
  0x70   : > { %3530 = vmatpush.bf16.msra.mxu2 %v3417_v42  ;;  %708 = vmatpush.bf16.msra.mxu0 %v3417_v42  ;;  %v3447_v51 = vld [vmem:[%s4672_s2 + $0xe0] sm:$0xff]  ;;  %v3446_v54 = vld [vmem:[%s4672_s2 + $0xd8] sm:$0xff]  ;;  %v3445_v57 = vld [vmem:[%s4672_s2 + $0xd0] sm:$0xff]  ;;  %s3713_s13 = scalar_lea.hbm %s3712_s12, 64  ;;  %p3718_p12 = scmp.lt.s32.totalorder %s3712_s12, %s4674_s4 }
  0x71   : > { %843 = vmatpush.bf16.msra.mxu1 %v3429_v43  ;;  %v3412_v58 = vld [vmem:[%s4672_s2 + $0x8] sm:$0xff]  ;;  %v3411_v61 = vld [vmem:[%s4672_s2] sm:$0xff]  ;;  %v3438_v63 = vld [vmem:[%s4672_s2 + $0xb8] sm:$0xff]  ;;  %p3714_p8 = scmp.ne.s32.totalorder %s3712_s12, %s3713_s13  ;;  %p3719_p0 = scmp.lt.s32.totalorder %s3717_s5, %s3713_s13 }
  0x72   : > { %1239 = vmatpush.bf16.msra.mxu3 %v3449_v45  ;;  %v3424_v59 = vld [vmem:[%s4672_s2 + $0x48] sm:$0xff]  ;;  %v3423_v62 = vld [vmem:[%s4672_s2 + $0x40] sm:$0xff]  ;;  %v3462_v0 = vld [vmem:[%s4672_s2 + $0x138] sm:$0xff] }
  0x73   : > { %v3444_v60 = vld [vmem:[%s4672_s2 + $0xc8] sm:$0xff]  ;;  %v3470_v1 = vld [vmem:[%s4672_s2 + $0x178] sm:$0xff]  ;;  %v3419_v3 = vld [vmem:[%s4247_s14 + $0x30] sm:$0xff]  ;;  %p3715_p9 = pnand %p3714_p8, %p4001_p10  ;;  %p3720_p1 = por %p3719_p0, %p3718_p12 }
  0x74   : > { %3531 = vmatpush.bf16.msra.mxu2 %v3416_v46  ;;  %709 = vmatpush.bf16.msra.mxu0 %v3416_v46  ;;  %v3409_v2 = vld [vmem:[%s4247_s14 + $0x18] sm:$0xff]  ;;  %v3407_v4 = vld [vmem:[%s4247_s14] sm:$0xff]  ;;  %v3437_v6 = vld [vmem:[%s4672_s2 + $0xb0] sm:$0xff] }
  0x75   : > { %844 = vmatpush.bf16.msra.mxu1 %v3428_v47  ;;  %v3443_v5 = vld [vmem:[%s4672_s2 + $0xc0] sm:$0xff]  ;;  %v3461_v7 = vld [vmem:[%s4672_s2 + $0x130] sm:$0xff]  ;;  %v3490_v10 = vld [vmem:[%s4672_s2 + $0x1b8] sm:$0xff]  ;;  %p3716_p11 = pneg %p3715_p9 }
  0x76   : > { %1240 = vmatpush.bf16.msra.mxu3 %v3448_v48  ;;  %v3439_v8 = vld [vmem:[%s4247_s14 + $0x60] sm:$0xff]  ;;  %v3469_v9 = vld [vmem:[%s4672_s2 + $0x170] sm:$0xff]  ;;  %v3436_v11 = vld [vmem:[%s4672_s2 + $0xa8] sm:$0xff] }
  0x77   : > { %v895_v12 = vld [vmem:[%s4247_s14] sm:$0xf]  ;;  %v896_v13 = vld [vmem:[%s4247_s14 + $0x4] sm:$0xf]  ;;  %v3489_v14 = vld [vmem:[%s4672_s2 + $0x1b0] sm:$0xff]  ;;  %p3721_p2 = pnand %p3720_p1, %p3716_p11 }
  0x78   : > { %3532 = vmatpush.bf16.msra.mxu2 %v3415_v49  ;;  %710 = vmatpush.bf16.msra.mxu0 %v3415_v49  ;;  %v3460_v15 = vld [vmem:[%s4672_s2 + $0x128] sm:$0xff]  ;;  %v911_v17 = vshrl.u32 %v895_v12, 16  ;;  %v914_v18 = vshll.u32 %v895_v12, 16  ;;  %v920_v19 = vshll.u32 %v896_v13, 16  ;;  %v924_v20 = vshrl.u32 %v896_v13, 16  ;;  %v3435_v21 = vld [vmem:[%s4672_s2 + $0xa0] sm:$0xff]  ;;  %vm4327_vm2 = vmor %vm907_vm0, %vm908_vm1 }
  0x79   : > { %845 = vmatpush.bf16.msra.mxu1 %v3427_v50  ;;  %v3468_v16 = vld [vmem:[%s4672_s2 + $0x168] sm:$0xff]  ;;  %v3459_v23 = vld [vmem:[%s4672_s2 + $0x120] sm:$0xff]  ;;  %v3434_v29 = vld [vmem:[%s4672_s2 + $0x98] sm:$0xff] }
  0x7a   : > { %1241 = vmatpush.bf16.msra.mxu3 %v3447_v51  ;;  %v3488_v22 = vld [vmem:[%s4672_s2 + $0x1a8] sm:$0xff]  ;;  %v3467_v24 = vld [vmem:[%s4672_s2 + $0x160] sm:$0xff]  ;;  %v913_v25 = vrot.slane %v911_v17, 4  ;;  %v916_v26 = vrot.slane %v914_v18, 5  ;;  %v922_v27 = vrot.slane %v920_v19, 5  ;;  %v926_v28 = vrot.slane %v924_v20, 4 }
  0x7b   : > { %v897_v30 = vld [vmem:[%s4247_s14 + $0x8] sm:$0x1]  ;;  %v3458_v31 = vld [vmem:[%s4672_s2 + $0x118] sm:$0xff]  ;;  %v3408_v34 = vld [vmem:[%s4247_s14 + $0xc] sm:$0xff] }
  0x7c   : > { %3533 = vmatpush.bf16.msra.mxu2 %v3414_v52  ;;  %711 = vmatpush.bf16.msra.mxu0 %v3414_v52  ;;  %v3410_v32 = vld [vmem:[%s4247_s14 + $0x24] sm:$0xff]  ;;  %v3420_v33 = vld [vmem:[%s4247_s14 + $0x3c] sm:$0xff]  ;;  %v917_v35 = vor.u32 %v916_v26, %v913_v25  ;;  %v927_v36 = vor.u32 %v926_v28, %v922_v27  ;;  %v930_v37 = vshll.u32 %v897_v30, 16  ;;  %v3433_v38 = vld [vmem:[%s4672_s2 + $0x90] sm:$0xff] }
  0x7d   : > { %846 = vmatpush.bf16.msra.mxu1 %v3426_v53  ;;  %v3457_v39 = vld [vmem:[%s4672_s2 + $0x110] sm:$0xff]  ;;  %v898_v40 = vld [vmem:[%s4247_s14 + $0xc] sm:$0xf]  ;;  %v3466_v42 = vld [vmem:[%s4672_s2 + $0x158] sm:$0xff] }
  0x7e   : > { %1242 = vmatpush.bf16.msra.mxu3 %v3446_v54  ;;  %v899_v41 = vld [vmem:[%s4247_s14 + $0x10] sm:$0xf]  ;;  %v3487_v44 = vld [vmem:[%s4672_s2 + $0x1a0] sm:$0xff]  ;;  %v918_v45 = vrot.slane %v917_v35, 4  ;;  %v928_v46 = vrot.slane %v927_v36, 4  ;;  %v932_v47 = vrot.slane %v930_v37, 5 }
  0x7f   : > { %v3440_v43 = vld [vmem:[%s4247_s14 + $0x6c] sm:$0xff]  ;;  %v935_v51 = vshrl.u32 %v898_v40, 16  ;;  %v938_v52 = vshll.u32 %v898_v40, 16  ;;  %v944_v53 = vshll.u32 %v899_v41, 16  ;;  %v948_v54 = vshrl.u32 %v899_v41, 16  ;;  %v3501_v28 = vld [vmem:[%s4672_s2 + $0x1f8] sm:$0xff] }
  0x80   : > { %3534 = vmatpush.bf16.msra.mxu2 %v3413_v55  ;;  %712 = vmatpush.bf16.msra.mxu0 %v3413_v55  ;;  %v3465_v48 = vld [vmem:[%s4672_s2 + $0x150] sm:$0xff]  ;;  %v3432_v49 = vld [vmem:[%s4672_s2 + $0x88] sm:$0xff]  ;;  %v3486_v55 = vld [vmem:[%s4672_s2 + $0x198] sm:$0xff] }
  0x81   : > { %847 = vmatpush.bf16.msra.mxu1 %v3425_v56  ;;  %v3456_v56 = vld [vmem:[%s4672_s2 + $0x108] sm:$0xff]  ;;  %v3480_v13 = vld [vmem:[%s4672_s2 + $0x1b0] sm:$0xff]  ;;  %v2988_v26 = vld [vmem:[%s4247_s14 + $0x64] sm:$0xf] }
  0x82   : > { %1243 = vmatpush.bf16.msra.mxu3 %v3445_v57  ;;  %v923_v57 = vsel %vm4327_vm2, %v918_v45, %v922_v27  ;;  %v3484_v12 = vld [vmem:[%s4672_s2 + $0x188] sm:$0xff]  ;;  %v3517_v25 = vld [vmem:[%s4672_s2 + $0x230] sm:$0xff]  ;;  %v3483_v27 = vld [vmem:[%s4672_s2 + $0x180] sm:$0xff]  ;;  %v1468_v40 = vshrl.u32 %v2988_v26, 16 }
  0x83   : > { %v3479_v20 = vld [vmem:[%s4672_s2 + $0x1a8] sm:$0xff]  ;;  %v3500_v41 = vld [vmem:[%s4672_s2 + $0x1f0] sm:$0xff] }
  0x84   : > { %3535 = vmatpush.bf16.msra.mxu2 %v3412_v58  ;;  %713 = vmatpush.bf16.msra.mxu0 %v3412_v58  ;;  %v933_v58 = vsel %vm4327_vm2, %v928_v46, %v932_v47 }
  0x85   : > { %848 = vmatpush.bf16.msra.mxu1 %v3424_v59  ;;  %v3464_v59 = vld [vmem:[%s4672_s2 + $0x148] sm:$0xff] }
  0x86   : > { %1244 = vmatpush.bf16.msra.mxu3 %v3444_v60  ;;  %v3431_v60 = vld [vmem:[%s4672_s2 + $0x80] sm:$0xff] }
  0x88   : > { %3536 = vmatpush.bf16.msra.mxu2 %v3411_v61  ;;  %714 = vmatpush.bf16.msra.mxu0 %v3411_v61  ;;  %v937_v61 = vrot.slane %v935_v51, 4 }
  0x89   : > { %849 = vmatpush.bf16.msra.mxu1 %v3423_v62  ;;  %v940_v62 = vrot.slane %v938_v52, 5 }
  0x8a   : > { %1245 = vmatpush.bf16.msra.mxu3 %v3443_v5  ;;  %v1023_v5 = vunpack.c.l.b16 %v923_v57 }
  0x8b   : > { %725 = vmatmul.bf16.vlgmr.msra.gmra.mxu2 %v3409_v2  ;;  %715 = vmatmul.bf16.vlgmr.msra.gmra.mxu0 %v3407_v4  ;;  %v3481_v2 = vld [vmem:[%s4672_s2 + $0x1b8] sm:$0xff]  ;;  %v900_v4 = vld [vmem:[%s4247_s14 + $0x14] sm:$0x1] }
  0x8c   : > { %1087 = vmatpush.bf16.msrb.mxu2 %v3438_v63  ;;  %1389 = vmatpush.bf16.msrb.mxu0 %v3462_v0  ;;  %v946_v63 = vrot.slane %v944_v53, 5  ;;  %v950_v0 = vrot.slane %v948_v54, 4  ;;  %v1470_v54 = vrot.slane %v1468_v40, 4 }
  0x8d   : > { %1631 = vmatpush.bf16.msrb.mxu1 %v3470_v1  ;;  %1246 = vmatmul.bf16.vlgmr.msra.gmra.mxu3 %v3439_v8  ;;  %v3485_v1 = vld [vmem:[%s4672_s2 + $0x190] sm:$0xff]  ;;  %v3463_v8 = vld [vmem:[%s4672_s2 + $0x140] sm:$0xff] }
  0x8e   : > { %850 = vmatmul.bf16.vlgmr.msra.gmra.mxu1 %v3419_v3  ;;  %1890 = vmatpush.bf16.msrb.mxu3 %v3490_v10  ;;  %v3455_v3 = vld [vmem:[%s4672_s2 + $0x100] sm:$0xff]  ;;  %v951_v10 = vor.u32 %v950_v0, %v946_v63 }
  0x90   : > { %1088 = vmatpush.bf16.msrb.mxu2 %v3437_v6  ;;  %1390 = vmatpush.bf16.msrb.mxu0 %v3461_v7  ;;  %v1024_v6 = vunpack.c.l.b16 %v933_v58  ;;  %v3518_v7 = vld [vmem:[%s4672_s2 + $0x238] sm:$0xff]  ;;  %v952_v18 = vrot.slane %v951_v10, 4 }
  0x91   : > { %1632 = vmatpush.bf16.msrb.mxu1 %v3469_v9  ;;  %v941_v9 = vor.u32 %v940_v62, %v937_v61  ;;  %v3422_v61 = vld [vmem:[%s4247_s14 + $0x54] sm:$0xff] }
  0x92   : > { %1891 = vmatpush.bf16.msrb.mxu3 %v3489_v14  ;;  %v3421_v14 = vld [vmem:[%s4247_s14 + $0x48] sm:$0xff] }
  0x93   : > { %v942_v17 = vrot.slane %v941_v9, 4 }
  0x94   : > { %1089 = vmatpush.bf16.msrb.mxu2 %v3436_v11  ;;  %1391 = vmatpush.bf16.msrb.mxu0 %v3460_v15  ;;  %v954_v11 = vshll.u32 %v900_v4, 16  ;;  %v1031_v15 = vpack.c.b16 %v1024_v6, %v1023_v5  ;;  %v904_v4 = vld [vmem:[%s4247_s14 + $0x24] sm:$0xf] }
  0x95   : > { %1633 = vmatpush.bf16.msrb.mxu1 %v3468_v16  ;;  %v3451_v16 = vld [vmem:[%s4247_s14 + $0x90] sm:$0xff] }
  0x96   : > { %1892 = vmatpush.bf16.msrb.mxu3 %v3488_v22  ;;  %v956_v19 = vrot.slane %v954_v11, 5  ;;  %v901_v22 = vld [vmem:[%s4247_s14 + $0x18] sm:$0xf] }
  0x98   : > { %1090 = vmatpush.bf16.msrb.mxu2 %v3435_v21  ;;  %1392 = vmatpush.bf16.msrb.mxu0 %v3459_v23  ;;  %v3441_v21 = vld [vmem:[%s4247_s14 + $0x78] sm:$0xff]  ;;  %v957_v30 = vsel %vm4327_vm2, %v952_v18, %v956_v19 }
  0x99   : > { %1634 = vmatpush.bf16.msrb.mxu1 %v3467_v24  ;;  %v902_v23 = vld [vmem:[%s4247_s14 + $0x1c] sm:$0xf]  ;;  %v2987_v24 = vld [vmem:[%s4247_s14 + $0x60] sm:$0xf] }
  0x9a   : > { %1893 = vmatpush.bf16.msrb.mxu3 %v3487_v44  ;;  %v968_v35 = vshll.u32 %v902_v23, 16  ;;  %v972_v36 = vshrl.u32 %v902_v23, 16  ;;  %v1455_v37 = vshrl.u32 %v2987_v24, 16  ;;  %v3497_v18 = vld [vmem:[%s4672_s2 + $0x1d8] sm:$0xff] }
  0x9b   : > { %730 = vmatmul.bf16.gmra.mxu2 %v3410_v32  ;;  %720 = vmatmul.bf16.gmra.mxu0 %v3408_v34  ;;  %v3478_v32 = vld [vmem:[%s4672_s2 + $0x1a0] sm:$0xff]  ;;  %v962_v34 = vshll.u32 %v901_v22, 16  ;;  %v3527_v23 = vld [vmem:[%s4672_s2 + $0x238] sm:$0xff] }
  0x9c   : > { %1091 = vmatpush.bf16.msrb.mxu2 %v3434_v29  ;;  %1393 = vmatpush.bf16.msrb.mxu0 %v3458_v31  ;;  %v947_v29 = vsel %vm4327_vm2, %v942_v17, %v946_v63  ;;  %v3516_v31 = vld [vmem:[%s4672_s2 + $0x228] sm:$0xff]  ;;  %v4401_v46 = vrot.slane %v968_v35, 5  ;;  %v974_v47 = vrot.slane %v972_v36, 4  ;;  %v1457_v51 = vrot.slane %v1455_v37, 4 }
  0x9d   : > { %1635 = vmatpush.bf16.msrb.mxu1 %v3466_v42  ;;  %1251 = vmatmul.bf16.gmra.mxu3 %v3440_v43  ;;  %v1025_v42 = vunpack.c.l.b16 %v947_v29  ;;  %v1026_v43 = vunpack.c.l.b16 %v957_v30  ;;  %v964_v45 = vrot.slane %v962_v34, 5  ;;  %v2990_v17 = vld [vmem:[%s4247_s14 + $0x6c] sm:$0xf] }
  0x9e   : > { %855 = vmatmul.bf16.gmra.mxu1 %v3420_v33  ;;  %1894 = vmatpush.bf16.msrb.mxu3 %v3486_v55  ;;  %v959_v33 = vshrl.u32 %v901_v22, 16  ;;  %v2989_v55 = vld [vmem:[%s4247_s14 + $0x68] sm:$0x1]  ;;  %v975_v58 = vor.u32 %v974_v47, %v4401_v46  ;;  %v3514_v22 = vld [vmem:[%s4672_s2 + $0x218] sm:$0xff]  ;;  %v1479_v29 = vshrl.u32 %v2990_v17, 16  ;;  %v1482_v30 = vshll.u32 %v2990_v17, 16 }
  0x9f   : > { %v1032_v62 = vpack.c.b16 %v1026_v43, %v1025_v42 }
  0xa0   : > { %1092 = vmatpush.bf16.msrb.mxu2 %v3433_v38  ;;  %1394 = vmatpush.bf16.msrb.mxu0 %v3457_v39  ;;  %v1458_v38 = vshll.u32 %v2987_v24, 16  ;;  %v1464_v39 = vshll.u32 %v2988_v26, 16  ;;  %v961_v44 = vrot.slane %v959_v33, 4  ;;  %v976_v6 = vrot.slane %v975_v58, 4  ;;  %v3496_v33 = vld [vmem:[%s4672_s2 + $0x1d0] sm:$0xff] }
  0xa1   : > { %1636 = vmatpush.bf16.msrb.mxu1 %v3465_v48  ;;  %v3477_v48 = vld [vmem:[%s4672_s2 + $0x198] sm:$0xff] }
  0xa2   : > { %1895 = vmatpush.bf16.msrb.mxu3 %v3485_v1  ;;  %v1460_v52 = vrot.slane %v1458_v38, 5  ;;  %v4407_v53 = vrot.slane %v1464_v39, 5  ;;  %v965_v57 = vor.u32 %v964_v45, %v961_v44  ;;  %v1474_v1 = vshll.u32 %v2989_v55, 16  ;;  %v3513_v38 = vld [vmem:[%s4672_s2 + $0x210] sm:$0xff]  ;;  %v906_v39 = vld [vmem:[%s4247_s14 + $0x2c] sm:$0x1] }
  0xa3   : > { %v1481_v44 = vrot.slane %v1479_v29, 4  ;;  %v1484_v45 = vrot.slane %v1482_v30, 5  ;;  %v3508_v30 = vld [vmem:[%s4672_s2 + $0x1e8] sm:$0xff] }
  0xa4   : > { %1093 = vmatpush.bf16.msrb.mxu2 %v3432_v49  ;;  %1395 = vmatpush.bf16.msrb.mxu0 %v3456_v56  ;;  %v903_v49 = vld [vmem:[%s4247_s14 + $0x20] sm:$0x1]  ;;  %v3499_v56 = vld [vmem:[%s4672_s2 + $0x1e8] sm:$0xff]  ;;  %v1461_v63 = vor.u32 %v1460_v52, %v1457_v51  ;;  %v1471_v0 = vor.u32 %v1470_v54, %v4407_v53  ;;  %v966_v5 = vrot.slane %v965_v57, 4  ;;  %v1476_v11 = vrot.slane %v1474_v1, 5 }
  0xa5   : > { %1637 = vmatpush.bf16.msrb.mxu1 %v3464_v59  ;;  %v978_v59 = vshll.u32 %v903_v49, 16  ;;  %v1002_v52 = vshll.u32 %v906_v39, 16  ;;  %v1485_v57 = vor.u32 %v1484_v45, %v1481_v44  ;;  %v2993_v1 = vld [vmem:[%s4247_s14 + $0x78] sm:$0xf] }
  0xa6   : > { %1896 = vmatpush.bf16.msrb.mxu3 %v3484_v12  ;;  %v1462_v9 = vrot.slane %v1461_v63, 4  ;;  %v1472_v10 = vrot.slane %v1471_v0, 4  ;;  %v3442_v12 = vld [vmem:[%s4247_s14 + $0x84] sm:$0xff]  ;;  %v971_v24 = vsel %vm4327_vm2, %v966_v5, %v4401_v46  ;;  %v3285_v5 = vld [vmem:[%s4247_s14 + $0xc] sm:$0xf] }
  0xa7   : > { %v1027_v40 = vunpack.c.l.b16 %v971_v24  ;;  %v1004_v63 = vrot.slane %v1002_v52, 5  ;;  %v3482_v0 = vld [vmem:[%s4478_s0] sm:$0xff] }
  0xa8   : > { %1094 = vmatpush.bf16.msrb.mxu2 %v3431_v60  ;;  %1396 = vmatpush.bf16.msrb.mxu0 %v3455_v3  ;;  %v3476_v60 = vld [vmem:[%s4672_s2 + $0x190] sm:$0xff]  ;;  %v3498_v3 = vld [vmem:[%s4672_s2 + $0x1e0] sm:$0xff] }
  0xa9   : > { %1638 = vmatpush.bf16.msrb.mxu1 %v3463_v8  ;;  %v905_v8 = vld [vmem:[%s4247_s14 + $0x28] sm:$0xf] }
  0xaa   : > { %1897 = vmatpush.bf16.msrb.mxu3 %v3483_v27  ;;  %v992_v19 = vshll.u32 %v905_v8, 16  ;;  %v1467_v27 = vsel %vm4327_vm2, %v1462_v9, %v4407_v53  ;;  %v2992_v53 = vld [vmem:[%s4247_s14 + $0x74] sm:$0x1]  ;;  %v3512_v9 = vld [vmem:[%s4672_s2 + $0x208] sm:$0xff] }
  0xab   : > { %1095 = vmatmul.bf16.vlgmr.msrb.gmra.mxu2 %v1031_v15  ;;  %1397 = vmatmul.bf16.vlgmr.msrb.gmra.mxu0 %v3451_v16  ;;  %v983_v15 = vshrl.u32 %v904_v4, 16  ;;  %v986_v16 = vshll.u32 %v904_v4, 16  ;;  %v1567_v42 = vunpack.c.l.b16 %v1467_v27  ;;  %v3526_v4 = vld [vmem:[%s4672_s2 + $0x230] sm:$0xff] }
  0xac   : > { %1780 = vmatpush.bf16.msra.mxu2 %v3481_v2  ;;  %2297 = vmatpush.bf16.msra.mxu0 %v3518_v7  ;;  %v3452_v2 = vld [vmem:[%s4247_s14 + $0x9c] sm:$0xff]  ;;  %v980_v7 = vrot.slane %v978_v59, 5  ;;  %v4460_v36 = vrot.slane %v992_v19, 5  ;;  %v1498_v59 = vshll.u32 %v2992_v53, 16 }
  0xad   : > { %1256 = vmatmul.bf16.gmra.mxu3 %v3441_v21  ;;  %v2991_v21 = vld [vmem:[%s4247_s14 + $0x70] sm:$0xf]  ;;  %2424 = vmatpush.bf16.msra.mxu1 %v3527_v23  ;;  %v985_v34 = vrot.slane %v983_v15, 4  ;;  %v988_v35 = vrot.slane %v986_v16, 5  ;;  %v3525_v16 = vld [vmem:[%s4672_s2 + $0x228] sm:$0xff]  ;;  %v3511_v19 = vld [vmem:[%s4672_s2 + $0x200] sm:$0xff] }
  0xae   : > { %860 = vmatmul.bf16.gmra.mxu1 %v3421_v14  ;;  %2004 = vmatpush.bf16.msra.mxu3 %v3501_v28  ;;  %v3515_v14 = vld [vmem:[%s4672_s2 + $0x220] sm:$0xff]  ;;  %v981_v26 = vsel %vm4327_vm2, %v976_v6, %v980_v7  ;;  %v1477_v28 = vsel %vm4327_vm2, %v1472_v10, %v1476_v11  ;;  %v1486_v6 = vrot.slane %v1485_v57, 4  ;;  %v3286_v10 = vld [vmem:[%s4247_s14 + $0x10] sm:$0xf] }
  0xaf   : > { %v1568_v43 = vunpack.c.l.b16 %v1477_v28  ;;  %v989_v49 = vor.u32 %v988_v35, %v985_v34  ;;  %v3509_v15 = vld [vmem:[%s4672_s2 + $0x1f0] sm:$0xff]  ;;  %v2162_v23 = vshrl.u32 %v3286_v10, 16 }
  0xb0   : > { %1781 = vmatpush.bf16.msra.mxu2 %v3480_v13  ;;  %2298 = vmatpush.bf16.msra.mxu0 %v3517_v25  ;;  %v3475_v13 = vld [vmem:[%s4672_s2 + $0x188] sm:$0xff]  ;;  %v3474_v25 = vld [vmem:[%s4672_s2 + $0x180] sm:$0xff] }
  0xb1   : > { %v1575_v55 = vpack.c.b16 %v1568_v43, %v1567_v42  ;;  %2425 = vmatpush.bf16.msra.mxu1 %v3526_v4  ;;  %v2164_v39 = vrot.slane %v2162_v23, 4 }
  0xb2   : > { %2005 = vmatpush.bf16.msra.mxu3 %v3500_v41  ;;  %v1028_v41 = vunpack.c.l.b16 %v981_v26 }
  0xb4   : > { %1782 = vmatpush.bf16.msra.mxu2 %v3479_v20  ;;  %2299 = vmatpush.bf16.msra.mxu0 %v3516_v31  ;;  %v996_v20 = vshrl.u32 %v905_v8, 16  ;;  %v1488_v31 = vshll.u32 %v2991_v21, 16  ;;  %v1033_v54 = vpack.c.b16 %v1028_v41, %v1027_v40  ;;  %v1500_v8 = vrot.slane %v1498_v59, 5  ;;  %v3287_v40 = vld [vmem:[%s4247_s14 + $0x14] sm:$0x1]  ;;  %v3524_v59 = vld [vmem:[%s4672_s2 + $0x220] sm:$0xff] }
  0xb5   : > { %2426 = vmatpush.bf16.msra.mxu1 %v3525_v16 }
  0xb6   : > { %2006 = vmatpush.bf16.msra.mxu3 %v3499_v56  ;;  %v998_v37 = vrot.slane %v996_v20, 4  ;;  %v4466_v46 = vrot.slane %v1488_v31, 5  ;;  %v3453_v56 = vld [vmem:[%s4247_s14 + $0xa8] sm:$0xff]  ;;  %v2149_v20 = vshrl.u32 %v3285_v5, 16 }
  0xb8   : > { %1783 = vmatpush.bf16.msra.mxu2 %v3478_v32  ;;  %2300 = vmatpush.bf16.msra.mxu0 %v3515_v14  ;;  %v1492_v32 = vshrl.u32 %v2991_v21, 16  ;;  %v999_v51 = vor.u32 %v998_v37, %v4460_v36  ;;  %v1506_v14 = vshll.u32 %v2993_v1, 16  ;;  %v2152_v21 = vshll.u32 %v3285_v5, 16  ;;  %v2995_v37 = vld [vmem:[%s4247_s14 + $0x80] sm:$0x1] }
  0xb9   : > { %v1491_v24 = vsel %vm4327_vm2, %v1486_v6, %v4466_v46  ;;  %v1522_v43 = vshll.u32 %v2995_v37, 16  ;;  %2427 = vmatpush.bf16.msra.mxu1 %v3524_v59  ;;  %v3505_v37 = vld [vmem:[%s4672_s2 + $0x1d0] sm:$0xff] }
  0xba   : > { %2007 = vmatpush.bf16.msra.mxu3 %v3498_v3  ;;  %v1494_v47 = vrot.slane %v1492_v32, 4  ;;  %v3510_v3 = vld [vmem:[%s4672_s2 + $0x1f8] sm:$0xff]  ;;  %v1508_v29 = vrot.slane %v1506_v14, 5  ;;  %v2154_v34 = vrot.slane %v2152_v21, 5  ;;  %v1569_v35 = vunpack.c.l.b16 %v1491_v24 }
  0xbb   : > { %1100 = vmatmul.bf16.gmra.mxu2 %v1032_v62  ;;  %1402 = vmatmul.bf16.gmra.mxu0 %v3452_v2  ;;  %v1000_v62 = vrot.slane %v999_v51, 4  ;;  %v2994_v2 = vld [vmem:[%s4247_s14 + $0x7c] sm:$0xf]  ;;  %v1524_v53 = vrot.slane %v1522_v43, 5 }
  0xbc   : > { %1784 = vmatpush.bf16.msra.mxu2 %v3477_v48  ;;  %2301 = vmatpush.bf16.msra.mxu0 %v3514_v22  ;;  %v3495_v48 = vld [vmem:[%s4672_s2 + $0x1c8] sm:$0xff]  ;;  %v1495_v58 = vor.u32 %v1494_v47, %v4466_v46  ;;  %v1512_v17 = vshll.u32 %v2994_v2, 16  ;;  %v2158_v22 = vshll.u32 %v3286_v10, 16 }
  0xbd   : > { %1261 = vmatmul.bf16.gmra.mxu3 %v3442_v12  ;;  %v1005_v12 = vsel %vm4327_vm2, %v1000_v62, %v1004_v63  ;;  %v3288_v62 = vld [vmem:[%s4247_s14 + $0x18] sm:$0xf] }
  0xbe   : > { %865 = vmatmul.bf16.gmra.mxu1 %v3422_v61  ;;  %2008 = vmatpush.bf16.msra.mxu3 %v3497_v18  ;;  %v990_v61 = vrot.slane %v989_v49, 4  ;;  %v1496_v7 = vrot.slane %v1495_v58, 4  ;;  %v1516_v18 = vshrl.u32 %v2994_v2, 16  ;;  %v1030_v27 = vunpack.c.l.b16 %v1005_v12  ;;  %v3454_v49 = vld [vmem:[%s4247_s14 + $0xb4] sm:$0xff]  ;;  %v2996_v58 = vld [vmem:[%s4247_s14 + $0x84] sm:$0xf] }
  0xbf   : > { %v1514_v31 = vrot.slane %v1512_v17, 5  ;;  %v3506_v63 = vld [vmem:[%s4672_s2 + $0x1d8] sm:$0xff]  ;;  %v1527_v4 = vshrl.u32 %v2996_v58, 16  ;;  %v1530_v5 = vshll.u32 %v2996_v58, 16  ;;  %v2173_v10 = vshrl.u32 %v3288_v62, 16 }
  0xc0   : > { %1785 = vmatpush.bf16.msra.mxu2 %v3476_v60  ;;  %2302 = vmatpush.bf16.msra.mxu0 %v3513_v38  ;;  %v3494_v60 = vld [vmem:[%s4672_s2 + $0x1c0] sm:$0xff]  ;;  %v995_v11 = vsel %vm4327_vm2, %v990_v61, %v4460_v36  ;;  %v1518_v32 = vrot.slane %v1516_v18, 4  ;;  %v2160_v38 = vrot.slane %v2158_v22, 5  ;;  %v2997_v61 = vld [vmem:[%s4247_s14 + $0x88] sm:$0xf] }
  0xc1   : > { %v1029_v26 = vunpack.c.l.b16 %v995_v11  ;;  %v2176_v11 = vshll.u32 %v3288_v62, 16  ;;  %v1529_v17 = vrot.slane %v1527_v4, 4  ;;  %v2998_v22 = vld [vmem:[%s4247_s14 + $0x8c] sm:$0x1]  ;;  %v2175_v23 = vrot.slane %v2173_v10, 4  ;;  %v3519_v10 = vld [vmem:[%s4478_s0] sm:$0xff] }
  0xc2   : > { %2009 = vmatpush.bf16.msra.mxu3 %v3496_v33  ;;  %v2151_v33 = vrot.slane %v2149_v20, 4  ;;  %v1519_v42 = vor.u32 %v1518_v32, %v1514_v31  ;;  %v2165_v47 = vor.u32 %v2164_v39, %v2160_v38  ;;  %v1546_v32 = vshll.u32 %v2998_v22, 16  ;;  %v2335_v4 = vld [vmem:[%s4478_s0 + $0x8] sm:$0x1] }
  0xc3   : > { %v1034_v45 = vpack.c.b16 %v1030_v27, %v1029_v26  ;;  %v2178_v24 = vrot.slane %v2176_v11, 5  ;;  %v3290_v27 = vld [vmem:[%s4247_s14 + $0x20] sm:$0x1]  ;;  %v2359_v11 = vunpack.c.l.b16 %v2335_v4 }
  0xc4   : > { %1786 = vmatpush.bf16.msra.mxu2 %v3475_v13  ;;  %v1503_v13 = vshrl.u32 %v2993_v1, 16  ;;  %2303 = vmatpush.bf16.msra.mxu0 %v3512_v9  ;;  %v2155_v44 = vor.u32 %v2154_v34, %v2151_v33  ;;  %v1520_v52 = vrot.slane %v1519_v42, 4  ;;  %v3289_v1 = vld [vmem:[%s4247_s14 + $0x1c] sm:$0xf]  ;;  %v1540_v9 = vshrl.u32 %v2997_v61, 16 }
  0xc5   : > { %v2182_v12 = vshll.u32 %v3289_v1, 16  ;;  %v2179_v34 = vor.u32 %v2178_v24, %v2175_v23  ;;  %v1548_v39 = vrot.slane %v1546_v32, 5  ;;  %v3696_v32 = vld [vmem:[%s4673_s3] ss:$0 sm:$0xff] }
  0xc6   : > { %2010 = vmatpush.bf16.msra.mxu3 %v3495_v48  ;;  %v1505_v28 = vrot.slane %v1503_v13, 4  ;;  %v2168_v48 = vshll.u32 %v3287_v40, 16  ;;  %v2186_v13 = vshrl.u32 %v3289_v1, 16  ;;  %v1542_v21 = vrot.slane %v1540_v9, 4  ;;  %v3492_v40 = vld [vmem:[%s4247_s14 + $0x48] sm:$0xff] }
  0xc7   : > { %v2180_v43 = vrot.slane %v2179_v34, 4 }
  0xc8   : > { %1787 = vmatpush.bf16.msra.mxu2 %v3474_v25  ;;  %v1501_v25 = vsel %vm4327_vm2, %v1496_v7, %v1500_v8  ;;  %2304 = vmatpush.bf16.msra.mxu0 %v3511_v19  ;;  %v1509_v41 = vor.u32 %v1508_v29, %v1505_v28  ;;  %v2170_v57 = vrot.slane %v2168_v48, 5  ;;  %v1536_v8 = vshll.u32 %v2997_v61, 16  ;;  %v3471_v29 = vld [vmem:[%s4247_s14 + $0xc] sm:$0xff] }
  0xc9   : > { %v1570_v36 = vunpack.c.l.b16 %v1501_v25  ;;  %v1532_v19 = vrot.slane %v1530_v5, 5  ;;  %v2184_v25 = vrot.slane %v2182_v12, 5  ;;  %v2188_v26 = vrot.slane %v2186_v13, 4  ;;  %v3504_v48 = vld [vmem:[%s4672_s2 + $0x1c8] sm:$0xff] }
  0xca   : > { %2011 = vmatpush.bf16.msra.mxu3 %v3494_v60  ;;  %v1510_v51 = vrot.slane %v1509_v41, 4  ;;  %v3507_v60 = vld [vmem:[%s4672_s2 + $0x1e0] sm:$0xff]  ;;  %v1538_v20 = vrot.slane %v1536_v8, 5  ;;  %v3522_v41 = vld [vmem:[%s4672_s2 + $0x210] sm:$0xff]  ;;  %v3293_v5 = vld [vmem:[%s4247_s14 + $0x2c] sm:$0x1] }
  0xcb   : > { %1105 = vmatmul.bf16.gmra.mxu2 %v1033_v54  ;;  %1407 = vmatmul.bf16.gmra.mxu0 %v3453_v56  ;;  %v1576_v46 = vpack.c.b16 %v1570_v36, %v1569_v35  ;;  %v3491_v54 = vld [vmem:[%s4247_s14 + $0x3c] sm:$0xff]  ;;  %v2166_v56 = vrot.slane %v2165_v47, 4  ;;  %v2189_v35 = vor.u32 %v2188_v26, %v2184_v25  ;;  %v2192_v36 = vshll.u32 %v3290_v27, 16  ;;  %v3292_v47 = vld [vmem:[%s4247_s14 + $0x28] sm:$0xf] }
  0xcc   : > { %2115 = vmatpush.bf16.msrb.mxu2 %v3510_v3  ;;  %v1515_v2 = vsel %vm4327_vm2, %v1510_v51, %v1514_v31  ;;  %v1525_v3 = vsel %vm4327_vm2, %v1520_v52, %v1524_v53  ;;  %v1543_v31 = vor.u32 %v1542_v21, %v1538_v20  ;;  %v2185_v52 = vsel %vm4327_vm2, %v2180_v43, %v2184_v25  ;;  %v3472_v8 = vld [vmem:[%s4247_s14 + $0x18] sm:$0xff] }
  0xcd   : > { %1898 = vmatmul.bf16.vlgmr.msrb.gmra.mxu3 %v3482_v0  ;;  %v3523_v0 = vld [vmem:[%s4672_s2 + $0x218] sm:$0xff]  ;;  %v2171_v7 = vsel %vm4327_vm2, %v2166_v56, %v2170_v57  ;;  %v1571_v14 = vunpack.c.l.b16 %v1515_v2  ;;  %v2206_v58 = vshll.u32 %v3292_v47, 16  ;;  %v2210_v59 = vshrl.u32 %v3292_v47, 16 }
  0xce   : > { %1639 = vmatmul.bf16.vlgmr.msrb.gmra.mxu1 %v1575_v55  ;;  %v2156_v55 = vrot.slane %v2155_v44, 4  ;;  %v2238_v18 = vunpack.c.l.b16 %v2171_v7  ;;  %v1544_v42 = vrot.slane %v1543_v31, 4  ;;  %v2190_v44 = vrot.slane %v2189_v35, 4 }
  0xcf   : > { %2428 = vmatpush.bf16.msra.mxu1 %v3523_v0  ;;  %v2239_v62 = vunpack.c.l.b16 %v2185_v52  ;;  %v2208_v2 = vrot.slane %v2206_v58, 5  ;;  %v2364_v21 = vshrl.u32 %v3519_v10, 16 }
  0xd0   : > { %2116 = vmatpush.bf16.msrb.mxu2 %v3509_v15  ;;  %v2161_v6 = vsel %vm4327_vm2, %v2156_v55, %v2160_v38  ;;  %v1572_v15 = vunpack.c.l.b16 %v1525_v3  ;;  %v1549_v51 = vsel %vm4327_vm2, %v1544_v42, %v1548_v39  ;;  %v3503_v55 = vld [vmem:[%s4672_s2 + $0x1c0] sm:$0xff]  ;;  %v2212_v3 = vrot.slane %v2210_v59, 4 }
  0xd1   : > { %v2237_v16 = vunpack.c.l.b16 %v2161_v6  ;;  %v1574_v61 = vunpack.c.l.b16 %v1549_v51  ;;  %v3520_v6 = vld [vmem:[%s4672_s2 + $0x200] sm:$0xff] }
  0xd2   : > { %v1577_v28 = vpack.c.b16 %v1572_v15, %v1571_v14  ;;  %v2213_v13 = vor.u32 %v2212_v3, %v2208_v2  ;;  %v2216_v14 = vshll.u32 %v3293_v5, 16  ;;  %v3493_v15 = vld [vmem:[%s4247_s14 + $0x54] sm:$0xff] }
  0xd3   : > { %v2243_v33 = vpack.c.b16 %v2238_v18, %v2237_v16  ;;  %2429 = vmatpush.bf16.msra.mxu1 %v3522_v41  ;;  %v2361_v16 = vpack.c.b16 %v2359_v11, %v2359_v11 }
  0xd4   : > { %2117 = vmatpush.bf16.msrb.mxu2 %v3508_v30  ;;  %v1533_v30 = vor.u32 %v1532_v19, %v1529_v17  ;;  %v2366_v17 = vshll.u32 %v3519_v10, 16  ;;  %v2214_v19 = vrot.slane %v2213_v13, 4 }
  0xd5   : > { %v2371_v23 = vshll.u32 %v2361_v16, 16 }
  0xd6   : > { %v1534_v38 = vrot.slane %v1533_v30, 4  ;;  %v2368_v22 = vrot.slane %v2366_v17, 1  ;;  %v3473_v30 = vld [vmem:[%s4247_s14 + $0x24] sm:$0xff] }
  0xd8   : > { %2118 = vmatpush.bf16.msrb.mxu2 %v3507_v60 }
  0xdb   : > { %1110 = vmatmul.bf16.gmra.mxu2 %v1034_v45  ;;  %1412 = vmatmul.bf16.gmra.mxu0 %v3454_v49  ;;  %v2194_v45 = vrot.slane %v2192_v36, 5  ;;  %v1539_v49 = vsel %vm4327_vm2, %v1534_v38, %v1538_v20  ;;  %v2218_v20 = vrot.slane %v2216_v14, 5 }
  0xdc   : > { %2119 = vmatpush.bf16.msrb.mxu2 %v3506_v63  ;;  %v1573_v60 = vunpack.c.l.b16 %v1539_v49 }
  0xdd   : > { %2012 = vmatmul.bf16.vlgmr.msra.gmra.mxu3 %v3491_v54  ;;  %v2195_v53 = vsel %vm4327_vm2, %v2190_v44, %v2194_v45  ;;  %v3521_v54 = vld [vmem:[%s4672_s2 + $0x208] sm:$0xff]  ;;  %v2219_v25 = vsel %vm4327_vm2, %v2214_v19, %v2218_v20 }
  0xde   : > { %1644 = vmatmul.bf16.gmra.mxu1 %v1576_v46  ;;  %v3291_v46 = vld [vmem:[%s4247_s14 + $0x24] sm:$0xf]  ;;  %v2240_v63 = vunpack.c.l.b16 %v2195_v53  ;;  %v1578_v7 = vpack.c.b16 %v1574_v61, %v1573_v60  ;;  %v2242_v27 = vunpack.c.l.b16 %v2219_v25  ;;  %s2674_s14 = sshll.u32 %s4217_s19, 6 }
  0xdf   : > { %v2197_v56 = vshrl.u32 %v3291_v46, 16  ;;  %v2200_v57 = vshll.u32 %v3291_v46, 16  ;;  %2430 = vmatpush.bf16.msra.mxu1 %v3521_v54  ;;  %v3502_v44 = vld [vmem:[%s4478_s0 + $0xc] sm:$0xff]  ;;  %s4603_s0 = scalar_lea.vmem [#allocation5], %s2674_s14 }
  0xe0   : > { %2120 = vmatpush.bf16.msrb.mxu2 %v3505_v37  ;;  %v2244_v9 = vpack.c.b16 %v2240_v63, %v2239_v62  ;;  %s2474_s27 = sshll.u32 %s4603_s0, 4  ;;  %s2475_s27 = int_to_ptr.vmem [resolvable:$true] %s2474_s27 }
  0xe1   : > { %v2199_v0 = vrot.slane %v2197_v56, 4  ;;  %v2202_v1 = vrot.slane %v2200_v57, 5 }
  0xe3   : > { %2431 = vmatpush.bf16.msra.mxu1 %v3520_v6  ;;  %v2203_v12 = vor.u32 %v2202_v1, %v2199_v0 }
  0xe4   : > { %2121 = vmatpush.bf16.msrb.mxu2 %v3504_v48 }
  0xe5   : > { %v2204_v18 = vrot.slane %v2203_v12, 4 }
  0xe7   : > { %v2209_v24 = vsel %vm4327_vm2, %v2204_v18, %v2208_v2 }
  0xe8   : > { %2122 = vmatpush.bf16.msrb.mxu2 %v3503_v55  ;;  %v2241_v26 = vunpack.c.l.b16 %v2209_v24 }
  0xeb   : > { %1788 = vmatmul.bf16.vlgmr.msra.gmra.mxu2 %v3471_v29  ;;  %2305 = vmatmul.bf16.vlgmr.msra.gmra.mxu0 %v2243_v33  ;;  %v2373_v29 = vrot.slane %v2371_v23, 1  ;;  %v2245_v33 = vpack.c.b16 %v2242_v27, %v2241_v26 }
  0xed   : > { %2017 = vmatmul.bf16.gmra.mxu3 %v3492_v40 }
  0xee   : > { %1649 = vmatmul.bf16.gmra.mxu1 %v1577_v28  ;;  %v2369_v28 = vor.u32 %v2368_v22, %v2364_v21 }
  0xf0   : > { %v2374_v34 = vsel %vm2362_vm3, %v2369_v28, %v2373_v29 }
  0xfb   : > { %1793 = vmatmul.bf16.gmra.mxu2 %v3472_v8  ;;  %2310 = vmatmul.bf16.gmra.mxu0 %v2244_v9 }
  0xfd   : > { %2022 = vmatmul.bf16.gmra.mxu3 %v3493_v15 }
  0xfe   : > { %1654 = vmatmul.bf16.gmra.mxu1 %v1578_v7 }
 0x108   : > { %v716_v35 = vpop.f32.mrf.mxu0 }
 0x109   : > { %v717_v36 = vadd.f32 %v3696_v32, %v716_v35 }
 0x10b   : > { %v851_v31 = vpop.f32.mrf.mxu1  ;;  %1798 = vmatmul.bf16.gmra.mxu2 %v3473_v30  ;;  %2315 = vmatmul.bf16.gmra.mxu0 %v2245_v33 }
 0x10c   : > { %v879_v50 = vadd.f32 %v851_v31, %v717_v36 }
 0x10e   : > { %2432 = vmatmul.bf16.vlgmr.msra.gmra.mxu1 %v2374_v34  ;;  %v726_v37 = vpop.f32.mrf.mxu2 }
 0x10f   : > { %v727_v58 = vadd.f32 %v3696_v32, %v726_v37 }
 0x110   : > { %v718_v39 = vpop.f32.mrf.mxu0  ;;  %v1247_v41 = vpop.f32.mrf.mxu3 }
 0x111   : > { %v719_v40 = vadd.f32 %v3696_v32, %v718_v39 }
 0x113   : > { %v853_v38 = vpop.f32.mrf.mxu1 }
 0x114   : > { %v880_v42 = vadd.f32 %v853_v38, %v719_v40 }
 0x116   : > { %v728_v43 = vpop.f32.mrf.mxu2 }
 0x117   : > { %v729_v0 = vadd.f32 %v3696_v32, %v728_v43 }
 0x118   : > { %v721_v46 = vpop.f32.mrf.mxu0  ;;  %v1249_v48 = vpop.f32.mrf.mxu3 }
 0x119   : > { %v722_v47 = vadd.f32 %v3696_v32, %v721_v46 }
 0x11b   : > { %v856_v45 = vpop.f32.mrf.mxu1  ;;  %2123 = vmatmul.bf16.vlgmr.msrb.gmra.mxu2 %v3502_v44 }
 0x11c   : > { %v881_v49 = vadd.f32 %v856_v45, %v722_v47 }
 0x11e   : > { %v731_v51 = vpop.f32.mrf.mxu2 }
 0x11f   : > { %v732_v8 = vadd.f32 %v3696_v32, %v731_v51 }
 0x120   : > { %v723_v53 = vpop.f32.mrf.mxu0  ;;  %v1252_v55 = vpop.f32.mrf.mxu3 }
 0x121   : > { %v724_v54 = vadd.f32 %v3696_v32, %v723_v53 }
 0x123   : > { %v858_v52 = vpop.f32.mrf.mxu1 }
 0x124   : > { %v882_v56 = vadd.f32 %v858_v52, %v724_v54 }
 0x126   : > { %v733_v57 = vpop.f32.mrf.mxu2 }
 0x127   : > { %v734_v16 = vadd.f32 %v3696_v32, %v733_v57 }
 0x128   : > { %v1398_v61 = vpop.f32.mrf.mxu0  ;;  %v1254_v62 = vpop.f32.mrf.mxu3 }
 0x12b   : > { %v861_v59 = vpop.f32.mrf.mxu1 }
 0x12c   : > { %v883_v60 = vadd.f32 %v861_v59, %v727_v58 }
 0x12e   : > { %v1096_v63 = vpop.f32.mrf.mxu2 }
 0x12f   : > { %v1124_v1 = vadd.f32 %v1096_v63, %v879_v50 }
 0x130   : > { %v1400_v5 = vpop.f32.mrf.mxu0  ;;  %v1257_v6 = vpop.f32.mrf.mxu3 }
 0x131   : > { %v1275_v4 = vadd.f32 %v1247_v41, %v1124_v1 }
 0x133   : > { %v863_v2 = vpop.f32.mrf.mxu1 }
 0x134   : > { %v884_v3 = vadd.f32 %v863_v2, %v729_v0 }
 0x136   : > { %v1098_v7 = vpop.f32.mrf.mxu2 }
 0x137   : > { %v1125_v9 = vadd.f32 %v1098_v7, %v880_v42 }
 0x138   : > { %v1403_v13 = vpop.f32.mrf.mxu0  ;;  %v1259_v14 = vpop.f32.mrf.mxu3 }
 0x139   : > { %v1276_v12 = vadd.f32 %v1249_v48, %v1125_v9 }
 0x13b   : > { %v866_v10 = vpop.f32.mrf.mxu1  ;;  %v1427_v58 = vadd.f32 %v1400_v5, %v1276_v12 }
 0x13c   : > { %v885_v11 = vadd.f32 %v866_v10, %v732_v8 }
 0x13e   : > { %v1101_v15 = vpop.f32.mrf.mxu2 }
 0x13f   : > { %v1126_v17 = vadd.f32 %v1101_v15, %v881_v49  ;;  %v1426_v49 = vadd.f32 %v1398_v61, %v1275_v4 }
 0x140   : > { %v1405_v21 = vpop.f32.mrf.mxu0  ;;  %v1262_v22 = vpop.f32.mrf.mxu3 }
 0x141   : > { %v1277_v20 = vadd.f32 %v1252_v55, %v1126_v17 }
 0x143   : > { %v868_v18 = vpop.f32.mrf.mxu1 }
 0x144   : > { %v886_v19 = vadd.f32 %v868_v18, %v734_v16 }
 0x146   : > { %v1103_v23 = vpop.f32.mrf.mxu2 }
 0x147   : > { %v1127_v24 = vadd.f32 %v1103_v23, %v882_v56 }
 0x148   : > { %v1408_v26 = vpop.f32.mrf.mxu0  ;;  %v1264_v27 = vpop.f32.mrf.mxu3 }
 0x149   : > { %v1278_v25 = vadd.f32 %v1254_v62, %v1127_v24 }
 0x14b   : > { %v1640_v29 = vpop.f32.mrf.mxu1 }
 0x14c   : > { %v1668_v51 = vadd.f32 %v1640_v29, %v1426_v49 }
 0x14e   : > { %v1106_v28 = vpop.f32.mrf.mxu2 }
 0x14f   : > { %v1128_v30 = vadd.f32 %v1106_v28, %v883_v60 }
 0x150   : > { %v4590_v33 = vpop.f32.mrf.mxu0  ;;  %v4592_v34 = vpop.f32.mrf.mxu3 }
 0x151   : > { %v1279_v31 = vadd.f32 %v1257_v6, %v1128_v30 }
 0x153   : > { %v1642_v36 = vpop.f32.mrf.mxu1 }
 0x154   : > { %v1669_v60 = vadd.f32 %v1642_v36, %v1427_v58 }
 0x156   : > { %v1108_v32 = vpop.f32.mrf.mxu2 }
 0x157   : > { %v1129_v35 = vadd.f32 %v1108_v32, %v884_v3  ;;  %v1428_v3 = vadd.f32 %v1403_v13, %v1277_v20 }
 0x158   : > { %v4594_v37 = vpop.f32.mrf.mxu0  ;;  %v4596_v38 = vpop.f32.mrf.mxu3 }
 0x159   : > { %v1280_v50 = vadd.f32 %v1259_v14, %v1129_v35 }
 0x15b   : > { %v1645_v43 = vpop.f32.mrf.mxu1 }
 0x15c   : > { %v1670_v6 = vadd.f32 %v1645_v43, %v1428_v3 }
 0x15e   : > { %v1111_v39 = vpop.f32.mrf.mxu2 }
 0x15f   : > { %v1130_v40 = vadd.f32 %v1111_v39, %v885_v11  ;;  %v1429_v11 = vadd.f32 %v1405_v21, %v1278_v25  ;;  %v1431_v25 = vadd.f32 %v4590_v33, %v1280_v50 }
 0x160   : > { %v4598_v42 = vpop.f32.mrf.mxu0  ;;  %v2013_v44 = vpop.f32.mrf.mxu3 }
 0x161   : > { %v1281_v41 = vadd.f32 %v1262_v22, %v1130_v40 }
 0x163   : > { %v1647_v52 = vpop.f32.mrf.mxu1 }
 0x164   : > { %v1671_v15 = vadd.f32 %v1647_v52, %v1429_v11 }
 0x166   : > { %v1113_v45 = vpop.f32.mrf.mxu2 }
 0x167   : > { %v1131_v46 = vadd.f32 %v1113_v45, %v886_v19  ;;  %v1430_v19 = vadd.f32 %v1408_v26, %v1279_v31  ;;  %v1432_v31 = vadd.f32 %v4594_v37, %v1281_v41 }
 0x168   : > { %v2306_v48 = vpop.f32.mrf.mxu0  ;;  %v2015_v54 = vpop.f32.mrf.mxu3 }
 0x169   : > { %v4600_v47 = vadd.f32 %v1264_v27, %v1131_v46 }
 0x16b   : > { %v1650_v63 = vpop.f32.mrf.mxu1  ;;  %v1433_v46 = vadd.f32 %v4598_v42, %v4600_v47 }
 0x16c   : > { %v1672_v23 = vadd.f32 %v1650_v63, %v1430_v19 }
 0x16e   : > { %v1789_v53 = vpop.f32.mrf.mxu2 }
 0x16f   : > { %v1804_v55 = vadd.f32 %v1789_v53, %v1668_v51 }
 0x170   : > { %v2308_v57 = vpop.f32.mrf.mxu0  ;;  %v2018_v61 = vpop.f32.mrf.mxu3 }
 0x171   : > { %v2028_v56 = vadd.f32 %v2013_v44, %v1804_v55 }
 0x173   : > { %v2321_v59 = vadd.f32 %v2306_v48, %v2028_v56  ;;  %v1652_v8 = vpop.f32.mrf.mxu1 }
 0x174   : > { %v1673_v30 = vadd.f32 %v1652_v8, %v1431_v25 }
 0x175   : > { %2450 = vst [vmem:[%s4603_s0] sm:$0xff] %v2321_v59 }
 0x176   : > { %v1791_v62 = vpop.f32.mrf.mxu2 }
 0x177   : > { %v1805_v0 = vadd.f32 %v1791_v62, %v1669_v60 }
 0x178   : > { %v2311_v2 = vpop.f32.mrf.mxu0  ;;  %v2020_v10 = vpop.f32.mrf.mxu3 }
 0x179   : > { %v2029_v1 = vadd.f32 %v2015_v54, %v1805_v0 }
 0x17b   : > { %v2322_v4 = vadd.f32 %v2308_v57, %v2029_v1  ;;  %v1655_v13 = vpop.f32.mrf.mxu1 }
 0x17c   : > { %v1674_v40 = vadd.f32 %v1655_v13, %v1432_v31 }
 0x17d   : > { %2451 = vst [vmem:[%s4603_s0 + $0x8] sm:$0xff] %v2322_v4 }
 0x17e   : > { %v1794_v7 = vpop.f32.mrf.mxu2  ;;  %v1904_v33 = vadd.f32 %v4592_v34, %v1674_v40 }
 0x17f   : > { %v1806_v5 = vadd.f32 %v1794_v7, %v1670_v6 }
 0x180   : > { %v2313_v14 = vpop.f32.mrf.mxu0  ;;  %v2023_v22 = vpop.f32.mrf.mxu3 }
 0x181   : > { %v2030_v9 = vadd.f32 %v2018_v61, %v1806_v5 }
 0x183   : > { %v2323_v12 = vadd.f32 %v2311_v2, %v2030_v9  ;;  %v1657_v32 = vpop.f32.mrf.mxu1 }
 0x184   : > { %v1675_v41 = vadd.f32 %v1657_v32, %v1433_v46 }
 0x185   : > { %2452 = vst [vmem:[%s4603_s0 + $0x10] sm:$0xff] %v2323_v12 }
 0x186   : > { %v1796_v16 = vpop.f32.mrf.mxu2  ;;  %v1905_v49 = vadd.f32 %v4596_v38, %v1675_v41 }
 0x187   : > { %v1807_v17 = vadd.f32 %v1796_v16, %v1671_v15 }
 0x188   : > { %v2316_v27 = vpop.f32.mrf.mxu0  ;;  %v2025_v26 = vpop.f32.mrf.mxu3 }
 0x189   : > { %v2031_v18 = vadd.f32 %v2020_v10, %v1807_v17 }
 0x18b   : > { %v2324_v20 = vadd.f32 %v2313_v14, %v2031_v18  ;;  %v2433_v50 = vpop.f32.mrf.mxu1 }
 0x18d   : > { %2453 = vst [vmem:[%s4603_s0 + $0x18] sm:$0xff] %v2324_v20 }
 0x18e   : > { %v1799_v24 = vpop.f32.mrf.mxu2 }
 0x18f   : > { %v1808_v28 = vadd.f32 %v1799_v24, %v1672_v23 }
 0x190   : > { %v2318_v39 = vpop.f32.mrf.mxu0 }
 0x191   : > { %v2032_v21 = vadd.f32 %v2023_v22, %v1808_v28 }
 0x193   : > { %v2325_v29 = vadd.f32 %v2316_v27, %v2032_v21  ;;  %v2435_v52 = vpop.f32.mrf.mxu1 }
 0x195   : > { %2454 = vst [vmem:[%s4603_s0 + $0x20] sm:$0xff] %v2325_v29 }
 0x196   : > { %v1801_v35 = vpop.f32.mrf.mxu2 }
 0x197   : > { %v1809_v36 = vadd.f32 %v1801_v35, %v1673_v30 }
 0x199   : > { %v2033_v43 = vadd.f32 %v2025_v26, %v1809_v36 }
 0x19b   : > { %v2326_v44 = vadd.f32 %v2318_v39, %v2033_v43 }
 0x19d   : > { %2455 = vst [vmem:[%s4603_s0 + $0x28] sm:$0xff] %v2326_v44 }
 0x19e   : > { %v2124_v45 = vpop.f32.mrf.mxu2 }
 0x19f   : > { %v2129_v37 = vadd.f32 %v2124_v45, %v1904_v33 }
 0x1a1   : > { %v2438_v48 = vadd.f32 %v2433_v50, %v2129_v37 }
 0x1a3   : > { %2456 = vst [vmem:[%s4603_s0 + $0x30] sm:$0xff] %v2438_v48 }
 0x1a6   : > { %v2126_v34 = vpop.f32.mrf.mxu2 }
 0x1a7   : > { %v2130_v51 = vadd.f32 %v2126_v34, %v1905_v49 }
 0x1a9   : > { %v2439_v42 = vadd.f32 %v2435_v52, %v2130_v51 }
 0x1ab   : > { %2457 = vst [vmem:[%s4603_s0 + $0x38] sm:$0xff] %v2439_v42 }
 0x1ac   : > { %3724 = shalt.err (!%p3721_p2)
}
 0x1ad   : > { %s3878_s19 = smov 128   ;;  %s3879_s0 = smov 8  }
 0x1ae   : > { %3543 = dma.vmem_to_hbm [thread:$0]  (%p4001_p10), %s2475_s27, 1024, %s2477_s30, %s2459_s11, %s3878_s19, %s3878_s19, %s3879_s0  }
 0x1af PF: > { %p3549_p3 = scmp.ge.s32.totalorder %s3844_s24, 2  ;;  %s2491_s9 = sand.u32 1, %s3808_s15  }
 0x1b0   : > { %s2492_s16 = scalar_lea.sflag [#allocation6], %s2491_s9 }
 0x1b1   : > { %p3546_p4 = pnand %p3549_p3, %p4009_p13 }
 0x1b3   : > { %p3547_p5 = pneg %p3546_p4 }
 0x1b5   : > { %3799 = dma.done.wait (%p3547_p5), %s2492_s16, 1024  }
 0x1b6   : > { %3801 = vsyncadd (%p3547_p5), %s2492_s16, 4294966272  ;;  %s17_s24 = sadd.s32 1, %s3844_s24   ;;  %s4698_s29 = sld [smem:[#allocation12_spill]] }
 0x1b7   : > { %p14_p6 = scmp.ge.s32.totalorder %s17_s24, 6   ;;  %s4699_s8 = sld [smem:[#allocation8_spill]] }
 0x1b8   : > { %s4700_s19 = sld [smem:[#allocation11_spill]]  ;;  %s4703_s15 = smov %s3820_s18 }
 0x1b9   : > { %s4701_s6 = sld [smem:[#allocation9_spill]]  ;;  %s4704_s16 = smov %s3816_s17 }
 0x1ba   : > { %s4702_s28 = sld [smem:[#allocation10_spill]]  ;;  %s4707_s20 = smov %s3836_s22 }
 0x1bb   : > { %s4708_s21 = smov %s3840_s23 }
 0x1bc   : > { %s4705_s17 = smov %s4698_s29  ;;  %16 = sbr.rel (!%p14_p6) target bundleno = 8 (0x8), region = 237 }
 0x1bd   : > { %s4706_s18 = smov %s4699_s8 }
 0x1bf   : > { %s4709_s22 = smov %s4701_s6 }
 0x1c0   : > { %s4710_s23 = smov %s4702_s28 }
 0x1c1   :  { %2498 = vsyncpa [#allocation6], 1 }
 0x1c2   :  { %2500 = vsyncpa [#allocation6 + $0x1], 1 }

</bundles_post_ra>
